<compile_context>
chip_gen: v5e
topology: v5e:2x2
jax: 0.10.0
libtpu: 0.0.40
codegen_flags: <defaults>
</compile_context>

<pallas_src>
import jax
import jax.numpy as jnp
import numpy as np
from jax.experimental import pallas as pl
from jax.experimental.pallas import tpu as pltpu


def _round_up(x, m):
    return ((x + m - 1) // m) * m


# ----------------------------- Pallas kernel ------------------------------ #
def gru_classifier_kernel(x_ref, h0_ref, wih_ref, whh_ref, bih_ref, bhh_ref,
                          w1_ref, b1_ref, w2_ref, b2_ref, o_ref, gi_scr):
    Bp = o_ref.shape[0]
    Hp = h0_ref.shape[1]
    T = x_ref.shape[0] // Bp

    # Non-recurrent input projection for ALL timesteps in one MXU matmul
    # (b_ih folded in here, off the serial critical path).
    gi_scr[...] = (
        jnp.dot(x_ref[...], wih_ref[...], preferred_element_type=jnp.float32)
        + bih_ref[...]
    )

    whh = whh_ref[...]
    bhh = jnp.broadcast_to(bhh_ref[...], (Bp, 3 * Hp))   # hoisted broadcast
    h0 = jnp.broadcast_to(h0_ref[...], (Bp, Hp))         # learned init state

    def step(t, h):
        row = pl.multiple_of(t * Bp, 8)                   # sublane-aligned slice
        gi = gi_scr[pl.ds(row, Bp), :]
        gh = jnp.dot(h, whh, preferred_element_type=jnp.float32) + bhh
        # PyTorch GRU gate order (r, z, n); each gate is one full 128-lane tile.
        r = jax.nn.sigmoid(gi[:, 0 * Hp:1 * Hp] + gh[:, 0 * Hp:1 * Hp])
        z = jax.nn.sigmoid(gi[:, 1 * Hp:2 * Hp] + gh[:, 1 * Hp:2 * Hp])
        n = jnp.tanh(gi[:, 2 * Hp:3 * Hp] + r * gh[:, 2 * Hp:3 * Hp])
        return n + z * (h - n)                            # == (1-z)*n + z*h

    h_last = jax.lax.fori_loop(0, T, step, h0, unroll=True)

    # Classifier on the last hidden state only (runs once; lane-dense output).
    hid = jnp.dot(h_last, w1_ref[...], preferred_element_type=jnp.float32) + b1_ref[...]
    hid = jnp.maximum(hid, 0.0)
    logits = jnp.dot(hid, w2_ref[...], preferred_element_type=jnp.float32) + b2_ref[...]
    o_ref[...] = logits.astype(o_ref.dtype)


# ------------------------------- wrapper ---------------------------------- #
def audio_classifier_rnn_forward(poses, params):
    """poses: (B, T, pose_size) float32 -> logits (B, cls)."""
    B, T, P = poses.shape
    assert T >= 1, "T == 0 would leave the output uninitialized"
    H = params["w_hh_t"].shape[0]
    C = params["w2_t"].shape[1]

    Bp = _round_up(B, 8)       # full sublane tile
    Hp = _round_up(H, 128)     # per-gate full lane tile
    Cp = _round_up(C, 128)     # lane-dense output
    f32 = jnp.float32

    def pad_gate_cols(w, rows_pad=None):
        # (rows, 3H) -> (rows_pad or rows, 3*Hp); gate g occupies [g*Hp, g*Hp+H)
        rows = w.shape[0]
        rp = rows if rows_pad is None else rows_pad
        out = jnp.zeros((rp, 3 * Hp), f32)
        for g in range(3):
            out = out.at[:rows, g * Hp:g * Hp + H].set(
                w[:, g * H:(g + 1) * H].astype(f32))
        return out

    wih_p = pad_gate_cols(params["w_ih_t"])               # (P, 3Hp)
    whh_p = pad_gate_cols(params["w_hh_t"], rows_pad=Hp)  # (Hp, 3Hp)
    bih_p = pad_gate_cols(params["b_ih"])                 # (1, 3Hp)
    bhh_p = pad_gate_cols(params["b_hh"])                 # (1, 3Hp)

    w1_p = jnp.zeros((Hp, Hp), f32).at[:H, :H].set(params["w1_t"].astype(f32))
    b1_p = jnp.zeros((1, Hp), f32).at[:, :H].set(params["b1"].astype(f32))
    w2_p = jnp.zeros((Hp, Cp), f32).at[:H, :C].set(params["w2_t"].astype(f32))
    b2_p = jnp.zeros((1, Cp), f32).at[:, :C].set(params["b2"].astype(f32))
    h0_p = jnp.zeros((1, Hp), f32).at[:, :H].set(
        params["init_h"].reshape(1, H).astype(f32))

    # (B,T,P) -> (T, Bp, P) -> (T*Bp, P): time-major, batch padded to a full
    # sublane tile; reshape done wrapper-side (free layout plumbing).
    x = jnp.zeros((T, Bp, P), f32).at[:, :B, :].set(
        jnp.transpose(poses.astype(f32), (1, 0, 2)))
    x2 = x.reshape(T * Bp, P)

    vmem = pl.BlockSpec(memory_space=pltpu.MemorySpace.VMEM)
    out_p = pl.pallas_call(
        gru_classifier_kernel,
        out_shape=jax.ShapeDtypeStruct((Bp, Cp), f32),
        in_specs=[vmem] * 10,
        out_specs=vmem,
        scratch_shapes=[pltpu.VMEM((T * Bp, 3 * Hp), jnp.float32)],
    )(x2, h0_p, wih_p, whh_p, bih_p, bhh_p, w1_p, b1_p, w2_p, b2_p)

    return out_p[:B, :C]


# --------------------------- parameter setup ------------------------------ #
def init_params(key, pose_size, hidden_size, cls):
    """Deterministic synthetic init mirroring the nn.Module's parameter shapes."""
    keys = jax.random.split(key, 10)
    kH = 1.0 / np.sqrt(hidden_size)

    # nn.GRU(pose_size, hidden_size): weight_ih (3H, P), weight_hh (3H, H), biases (3H,)
    w_ih = jax.random.uniform(keys[0], (3 * hidden_size, pose_size), minval=-kH, maxval=kH)
    w_hh = jax.random.uniform(keys[1], (3 * hidden_size, hidden_size), minval=-kH, maxval=kH)
    b_ih = jax.random.uniform(keys[2], (3 * hidden_size,), minval=-kH, maxval=kH)
    b_hh = jax.random.uniform(keys[3], (3 * hidden_size,), minval=-kH, maxval=kH)

    # classifier: Linear(H, H) then Linear(H, cls)
    w1 = jax.random.uniform(keys[4], (hidden_size, hidden_size), minval=-kH, maxval=kH)
    b1 = jax.random.uniform(keys[5], (hidden_size,), minval=-kH, maxval=kH)
    w2 = jax.random.uniform(keys[6], (cls, hidden_size), minval=-kH, maxval=kH)
    b2 = jax.random.uniform(keys[7], (cls,), minval=-kH, maxval=kH)

    # init_h: nn.Parameter(torch.randn(1, 1, hidden_size))
    init_h = jax.random.normal(keys[8], (1, 1, hidden_size))

    return {
        "w_ih_t": w_ih.T.astype(jnp.float32),               # (P, 3H)
        "w_hh_t": w_hh.T.astype(jnp.float32),               # (H, 3H)
        "b_ih": b_ih.reshape(1, -1).astype(jnp.float32),    # (1, 3H)
        "b_hh": b_hh.reshape(1, -1).astype(jnp.float32),    # (1, 3H)
        "w1_t": w1.T.astype(jnp.float32),                   # (H, H)
        "b1": b1.reshape(1, -1).astype(jnp.float32),        # (1, H)
        "w2_t": w2.T.astype(jnp.float32),                   # (H, cls)
        "b2": b2.reshape(1, -1).astype(jnp.float32),        # (1, cls)
        "init_h": init_h.astype(jnp.float32),               # (1, 1, H)
    }


# ---------------------------- pure-JAX reference --------------------------- #
def reference_forward(poses, params):
    B, T, P = poses.shape
    H = params["w_hh_t"].shape[0]
    h = jnp.broadcast_to(params["init_h"].reshape(1, H), (B, H)).astype(jnp.float32)
    wih, whh = params["w_ih_t"], params["w_hh_t"]
    bih, bhh = params["b_ih"], params["b_hh"]

    def step(h, x):
        gi = x @ wih + bih
        gh = h @ whh + bhh
        r = jax.nn.sigmoid(gi[:, :H] + gh[:, :H])
        z = jax.nn.sigmoid(gi[:, H:2 * H] + gh[:, H:2 * H])
        n = jnp.tanh(gi[:, 2 * H:] + r * gh[:, 2 * H:])
        return (1.0 - z) * n + z * h, None

    h, _ = jax.lax.scan(step, h, jnp.transpose(poses, (1, 0, 2)))
    hid = jnp.maximum(h @ params["w1_t"] + params["b1"], 0.0)
    return hid @ params["w2_t"] + params["b2"]


# --------------------------------- main ------------------------------------ #
if __name__ == "__main__":
    # Module config: dim_z_motion / h_init unused in forward.
    B, T = 2, 8
    pose_size, hidden_size, cls = 16, 32, 4

    key = jax.random.PRNGKey(0)
    kp, kx = jax.random.split(key)
    params = init_params(kp, pose_size, hidden_size, cls)
    poses = jax.random.normal(kx, (B, T, pose_size), dtype=jnp.float32)

    out = audio_classifier_rnn_forward(poses, params)
    out = jax.block_until_ready(out)

    ref = jax.block_until_ready(reference_forward(poses, params))
    np.testing.assert_allclose(np.asarray(out), np.asarray(ref), rtol=2e-3, atol=2e-3)

    print("KERNEL_OK")
</pallas_src>

<mosaic_0001>
module attributes {stable_mosaic.version = 11 : i64} {
  func.func @gru_classifier_kernel(%arg0: memref<64x16xf32, #tpu.memory_space<vmem>>, %arg1: memref<1x128xf32, #tpu.memory_space<vmem>>, %arg2: memref<16x384xf32, #tpu.memory_space<vmem>>, %arg3: memref<128x384xf32, #tpu.memory_space<vmem>>, %arg4: memref<1x384xf32, #tpu.memory_space<vmem>>, %arg5: memref<1x384xf32, #tpu.memory_space<vmem>>, %arg6: memref<128x128xf32, #tpu.memory_space<vmem>>, %arg7: memref<1x128xf32, #tpu.memory_space<vmem>>, %arg8: memref<128x128xf32, #tpu.memory_space<vmem>>, %arg9: memref<1x128xf32, #tpu.memory_space<vmem>>, %arg10: memref<8x128xf32, #tpu.memory_space<vmem>>, %arg11: memref<64x384xf32, #tpu.memory_space<vmem>>) attributes {dimension_semantics = [], scalar_prefetch = 0 : i64, scratch_operands = 1 : i64, tpu.core_type = #tpu.core_type<tc>} {
    %c0 = arith.constant 0 : index
    %c0_0 = arith.constant 0 : index
    %0 = vector.load %arg0[%c0, %c0_0] : memref<64x16xf32, #tpu.memory_space<vmem>>, vector<64x16xf32>
    %c0_1 = arith.constant 0 : index
    %c0_2 = arith.constant 0 : index
    %1 = vector.load %arg2[%c0_1, %c0_2] : memref<16x384xf32, #tpu.memory_space<vmem>>, vector<16x384xf32>
    %cst = arith.constant dense<0.000000e+00> : vector<64x384xf32>
    %2 = tpu.matmul %0, %1, %cst {dimension_numbers = #tpu.dot_dimension_numbers<[1], [0], [0], [1], [0, 0, 1, 1], [], []>} : vector<64x16xf32>, vector<16x384xf32>, vector<64x384xf32> -> vector<64x384xf32>
    %c0_3 = arith.constant 0 : index
    %c0_4 = arith.constant 0 : index
    %3 = vector.load %arg4[%c0_3, %c0_4] : memref<1x384xf32, #tpu.memory_space<vmem>>, vector<1x384xf32>
    %4 = vector.broadcast %3 : vector<1x384xf32> to vector<64x384xf32>
    %5 = arith.addf %2, %4 : vector<64x384xf32>
    %c0_5 = arith.constant 0 : index
    %c0_6 = arith.constant 0 : index
    %6 = vector.load %arg11[%c0_5, %c0_6] : memref<64x384xf32, #tpu.memory_space<vmem>>, vector<64x384xf32>
    tpu.vector_store %arg11[%c0_5, %c0_6], %5 {strides = array<i32>} : memref<64x384xf32, #tpu.memory_space<vmem>>, vector<64x384xf32>,
    %c0_7 = arith.constant 0 : index
    %c0_8 = arith.constant 0 : index
    %7 = vector.load %arg3[%c0_7, %c0_8] : memref<128x384xf32, #tpu.memory_space<vmem>>, vector<128x384xf32>
    %c0_9 = arith.constant 0 : index
    %c0_10 = arith.constant 0 : index
    %8 = vector.load %arg5[%c0_9, %c0_10] : memref<1x384xf32, #tpu.memory_space<vmem>>, vector<1x384xf32>
    %9 = vector.shape_cast %8 : vector<1x384xf32> to vector<1x384xf32>
    %10 = vector.broadcast %9 : vector<1x384xf32> to vector<8x384xf32>
    %c0_11 = arith.constant 0 : index
    %c0_12 = arith.constant 0 : index
    %11 = vector.load %arg1[%c0_11, %c0_12] : memref<1x128xf32, #tpu.memory_space<vmem>>, vector<1x128xf32>
    %12 = vector.shape_cast %11 : vector<1x128xf32> to vector<1x128xf32>
    %13 = vector.broadcast %12 : vector<1x128xf32> to vector<8x128xf32>
    %c0_i32 = arith.constant 0 : i32
    %c8_i32 = arith.constant 8 : i32
    %14 = arith.muli %c0_i32, %c8_i32 : i32
    %15 = tpu.assume_multiple %14, 8 : i32
    %16 = arith.index_cast %15 : i32 to index
    %c0_13 = arith.constant 0 : index
    %17 = vector.load %arg11[%16, %c0_13] : memref<64x384xf32, #tpu.memory_space<vmem>>, vector<8x384xf32>
    %cst_14 = arith.constant dense<0.000000e+00> : vector<8x384xf32>
    %18 = tpu.matmul %13, %7, %cst_14 {dimension_numbers = #tpu.dot_dimension_numbers<[1], [0], [0], [1], [0, 0, 1, 1], [], []>} : vector<8x128xf32>, vector<128x384xf32>, vector<8x384xf32> -> vector<8x384xf32>
    %19 = arith.addf %18, %10 : vector<8x384xf32>
    %20 = vector.extract_strided_slice %17 {offsets = [0, 0], sizes = [8, 128], strides = [1, 1]} : vector<8x384xf32> to vector<8x128xf32>
    %21 = vector.extract_strided_slice %19 {offsets = [0, 0], sizes = [8, 128], strides = [1, 1]} : vector<8x384xf32> to vector<8x128xf32>
    %22 = arith.addf %20, %21 : vector<8x128xf32>
    %23 = arith.negf %22 : vector<8x128xf32>
    %24 = math.exp %23 : vector<8x128xf32>
    %cst_15 = arith.constant 1.000000e+00 : f32
    %25 = vector.broadcast %cst_15 : f32 to vector<8x128xf32>
    %26 = arith.addf %25, %24 : vector<8x128xf32>
    %27 = arith.divf %25, %26 : vector<8x128xf32>
    %28 = vector.extract_strided_slice %17 {offsets = [0, 128], sizes = [8, 128], strides = [1, 1]} : vector<8x384xf32> to vector<8x128xf32>
    %29 = vector.extract_strided_slice %19 {offsets = [0, 128], sizes = [8, 128], strides = [1, 1]} : vector<8x384xf32> to vector<8x128xf32>
    %30 = arith.addf %28, %29 : vector<8x128xf32>
    %31 = arith.negf %30 : vector<8x128xf32>
    %32 = math.exp %31 : vector<8x128xf32>
    %cst_16 = arith.constant 1.000000e+00 : f32
    %33 = vector.broadcast %cst_16 : f32 to vector<8x128xf32>
    %34 = arith.addf %33, %32 : vector<8x128xf32>
    %35 = arith.divf %33, %34 : vector<8x128xf32>
    %36 = vector.extract_strided_slice %17 {offsets = [0, 256], sizes = [8, 128], strides = [1, 1]} : vector<8x384xf32> to vector<8x128xf32>
    %37 = vector.extract_strided_slice %19 {offsets = [0, 256], sizes = [8, 128], strides = [1, 1]} : vector<8x384xf32> to vector<8x128xf32>
    %38 = arith.mulf %27, %37 : vector<8x128xf32>
    %39 = arith.addf %36, %38 : vector<8x128xf32>
    %40 = math.tanh %39 : vector<8x128xf32>
    %41 = arith.subf %13, %40 : vector<8x128xf32>
    %42 = arith.mulf %35, %41 : vector<8x128xf32>
    %43 = arith.addf %40, %42 : vector<8x128xf32>
    %c1_i32 = arith.constant 1 : i32
    %c8_i32_17 = arith.constant 8 : i32
    %44 = arith.muli %c1_i32, %c8_i32_17 : i32
    %45 = tpu.assume_multiple %44, 8 : i32
    %46 = arith.index_cast %45 : i32 to index
    %c0_18 = arith.constant 0 : index
    %47 = vector.load %arg11[%46, %c0_18] : memref<64x384xf32, #tpu.memory_space<vmem>>, vector<8x384xf32>
    %cst_19 = arith.constant dense<0.000000e+00> : vector<8x384xf32>
    %48 = tpu.matmul %43, %7, %cst_19 {dimension_numbers = #tpu.dot_dimension_numbers<[1], [0], [0], [1], [0, 0, 1, 1], [], []>} : vector<8x128xf32>, vector<128x384xf32>, vector<8x384xf32> -> vector<8x384xf32>
    %49 = arith.addf %48, %10 : vector<8x384xf32>
    %50 = vector.extract_strided_slice %47 {offsets = [0, 0], sizes = [8, 128], strides = [1, 1]} : vector<8x384xf32> to vector<8x128xf32>
    %51 = vector.extract_strided_slice %49 {offsets = [0, 0], sizes = [8, 128], strides = [1, 1]} : vector<8x384xf32> to vector<8x128xf32>
    %52 = arith.addf %50, %51 : vector<8x128xf32>
    %53 = arith.negf %52 : vector<8x128xf32>
    %54 = math.exp %53 : vector<8x128xf32>
    %cst_20 = arith.constant 1.000000e+00 : f32
    %55 = vector.broadcast %cst_20 : f32 to vector<8x128xf32>
    %56 = arith.addf %55, %54 : vector<8x128xf32>
    %57 = arith.divf %55, %56 : vector<8x128xf32>
    %58 = vector.extract_strided_slice %47 {offsets = [0, 128], sizes = [8, 128], strides = [1, 1]} : vector<8x384xf32> to vector<8x128xf32>
    %59 = vector.extract_strided_slice %49 {offsets = [0, 128], sizes = [8, 128], strides = [1, 1]} : vector<8x384xf32> to vector<8x128xf32>
    %60 = arith.addf %58, %59 : vector<8x128xf32>
    %61 = arith.negf %60 : vector<8x128xf32>
    %62 = math.exp %61 : vector<8x128xf32>
    %cst_21 = arith.constant 1.000000e+00 : f32
    %63 = vector.broadcast %cst_21 : f32 to vector<8x128xf32>
    %64 = arith.addf %63, %62 : vector<8x128xf32>
    %65 = arith.divf %63, %64 : vector<8x128xf32>
    %66 = vector.extract_strided_slice %47 {offsets = [0, 256], sizes = [8, 128], strides = [1, 1]} : vector<8x384xf32> to vector<8x128xf32>
    %67 = vector.extract_strided_slice %49 {offsets = [0, 256], sizes = [8, 128], strides = [1, 1]} : vector<8x384xf32> to vector<8x128xf32>
    %68 = arith.mulf %57, %67 : vector<8x128xf32>
    %69 = arith.addf %66, %68 : vector<8x128xf32>
    %70 = math.tanh %69 : vector<8x128xf32>
    %71 = arith.subf %43, %70 : vector<8x128xf32>
    %72 = arith.mulf %65, %71 : vector<8x128xf32>
    %73 = arith.addf %70, %72 : vector<8x128xf32>
    %c2_i32 = arith.constant 2 : i32
    %c8_i32_22 = arith.constant 8 : i32
    %74 = arith.muli %c2_i32, %c8_i32_22 : i32
    %75 = tpu.assume_multiple %74, 8 : i32
    %76 = arith.index_cast %75 : i32 to index
    %c0_23 = arith.constant 0 : index
    %77 = vector.load %arg11[%76, %c0_23] : memref<64x384xf32, #tpu.memory_space<vmem>>, vector<8x384xf32>
    %cst_24 = arith.constant dense<0.000000e+00> : vector<8x384xf32>
    %78 = tpu.matmul %73, %7, %cst_24 {dimension_numbers = #tpu.dot_dimension_numbers<[1], [0], [0], [1], [0, 0, 1, 1], [], []>} : vector<8x128xf32>, vector<128x384xf32>, vector<8x384xf32> -> vector<8x384xf32>
    %79 = arith.addf %78, %10 : vector<8x384xf32>
    %80 = vector.extract_strided_slice %77 {offsets = [0, 0], sizes = [8, 128], strides = [1, 1]} : vector<8x384xf32> to vector<8x128xf32>
    %81 = vector.extract_strided_slice %79 {offsets = [0, 0], sizes = [8, 128], strides = [1, 1]} : vector<8x384xf32> to vector<8x128xf32>
    %82 = arith.addf %80, %81 : vector<8x128xf32>
    %83 = arith.negf %82 : vector<8x128xf32>
    %84 = math.exp %83 : vector<8x128xf32>
    %cst_25 = arith.constant 1.000000e+00 : f32
    %85 = vector.broadcast %cst_25 : f32 to vector<8x128xf32>
    %86 = arith.addf %85, %84 : vector<8x128xf32>
    %87 = arith.divf %85, %86 : vector<8x128xf32>
    %88 = vector.extract_strided_slice %77 {offsets = [0, 128], sizes = [8, 128], strides = [1, 1]} : vector<8x384xf32> to vector<8x128xf32>
    %89 = vector.extract_strided_slice %79 {offsets = [0, 128], sizes = [8, 128], strides = [1, 1]} : vector<8x384xf32> to vector<8x128xf32>
    %90 = arith.addf %88, %89 : vector<8x128xf32>
    %91 = arith.negf %90 : vector<8x128xf32>
    %92 = math.exp %91 : vector<8x128xf32>
    %cst_26 = arith.constant 1.000000e+00 : f32
    %93 = vector.broadcast %cst_26 : f32 to vector<8x128xf32>
    %94 = arith.addf %93, %92 : vector<8x128xf32>
    %95 = arith.divf %93, %94 : vector<8x128xf32>
    %96 = vector.extract_strided_slice %77 {offsets = [0, 256], sizes = [8, 128], strides = [1, 1]} : vector<8x384xf32> to vector<8x128xf32>
    %97 = vector.extract_strided_slice %79 {offsets = [0, 256], sizes = [8, 128], strides = [1, 1]} : vector<8x384xf32> to vector<8x128xf32>
    %98 = arith.mulf %87, %97 : vector<8x128xf32>
    %99 = arith.addf %96, %98 : vector<8x128xf32>
    %100 = math.tanh %99 : vector<8x128xf32>
    %101 = arith.subf %73, %100 : vector<8x128xf32>
    %102 = arith.mulf %95, %101 : vector<8x128xf32>
    %103 = arith.addf %100, %102 : vector<8x128xf32>
    %c3_i32 = arith.constant 3 : i32
    %c8_i32_27 = arith.constant 8 : i32
    %104 = arith.muli %c3_i32, %c8_i32_27 : i32
    %105 = tpu.assume_multiple %104, 8 : i32
    %106 = arith.index_cast %105 : i32 to index
    %c0_28 = arith.constant 0 : index
    %107 = vector.load %arg11[%106, %c0_28] : memref<64x384xf32, #tpu.memory_space<vmem>>, vector<8x384xf32>
    %cst_29 = arith.constant dense<0.000000e+00> : vector<8x384xf32>
    %108 = tpu.matmul %103, %7, %cst_29 {dimension_numbers = #tpu.dot_dimension_numbers<[1], [0], [0], [1], [0, 0, 1, 1], [], []>} : vector<8x128xf32>, vector<128x384xf32>, vector<8x384xf32> -> vector<8x384xf32>
    %109 = arith.addf %108, %10 : vector<8x384xf32>
    %110 = vector.extract_strided_slice %107 {offsets = [0, 0], sizes = [8, 128], strides = [1, 1]} : vector<8x384xf32> to vector<8x128xf32>
    %111 = vector.extract_strided_slice %109 {offsets = [0, 0], sizes = [8, 128], strides = [1, 1]} : vector<8x384xf32> to vector<8x128xf32>
    %112 = arith.addf %110, %111 : vector<8x128xf32>
    %113 = arith.negf %112 : vector<8x128xf32>
    %114 = math.exp %113 : vector<8x128xf32>
    %cst_30 = arith.constant 1.000000e+00 : f32
    %115 = vector.broadcast %cst_30 : f32 to vector<8x128xf32>
    %116 = arith.addf %115, %114 : vector<8x128xf32>
    %117 = arith.divf %115, %116 : vector<8x128xf32>
    %118 = vector.extract_strided_slice %107 {offsets = [0, 128], sizes = [8, 128], strides = [1, 1]} : vector<8x384xf32> to vector<8x128xf32>
    %119 = vector.extract_strided_slice %109 {offsets = [0, 128], sizes = [8, 128], strides = [1, 1]} : vector<8x384xf32> to vector<8x128xf32>
    %120 = arith.addf %118, %119 : vector<8x128xf32>
    %121 = arith.negf %120 : vector<8x128xf32>
    %122 = math.exp %121 : vector<8x128xf32>
    %cst_31 = arith.constant 1.000000e+00 : f32
    %123 = vector.broadcast %cst_31 : f32 to vector<8x128xf32>
    %124 = arith.addf %123, %122 : vector<8x128xf32>
    %125 = arith.divf %123, %124 : vector<8x128xf32>
    %126 = vector.extract_strided_slice %107 {offsets = [0, 256], sizes = [8, 128], strides = [1, 1]} : vector<8x384xf32> to vector<8x128xf32>
    %127 = vector.extract_strided_slice %109 {offsets = [0, 256], sizes = [8, 128], strides = [1, 1]} : vector<8x384xf32> to vector<8x128xf32>
    %128 = arith.mulf %117, %127 : vector<8x128xf32>
    %129 = arith.addf %126, %128 : vector<8x128xf32>
    %130 = math.tanh %129 : vector<8x128xf32>
    %131 = arith.subf %103, %130 : vector<8x128xf32>
    %132 = arith.mulf %125, %131 : vector<8x128xf32>
    %133 = arith.addf %130, %132 : vector<8x128xf32>
    %c4_i32 = arith.constant 4 : i32
    %c8_i32_32 = arith.constant 8 : i32
    %134 = arith.muli %c4_i32, %c8_i32_32 : i32
    %135 = tpu.assume_multiple %134, 8 : i32
    %136 = arith.index_cast %135 : i32 to index
    %c0_33 = arith.constant 0 : index
    %137 = vector.load %arg11[%136, %c0_33] : memref<64x384xf32, #tpu.memory_space<vmem>>, vector<8x384xf32>
    %cst_34 = arith.constant dense<0.000000e+00> : vector<8x384xf32>
    %138 = tpu.matmul %133, %7, %cst_34 {dimension_numbers = #tpu.dot_dimension_numbers<[1], [0], [0], [1], [0, 0, 1, 1], [], []>} : vector<8x128xf32>, vector<128x384xf32>, vector<8x384xf32> -> vector<8x384xf32>
    %139 = arith.addf %138, %10 : vector<8x384xf32>
    %140 = vector.extract_strided_slice %137 {offsets = [0, 0], sizes = [8, 128], strides = [1, 1]} : vector<8x384xf32> to vector<8x128xf32>
    %141 = vector.extract_strided_slice %139 {offsets = [0, 0], sizes = [8, 128], strides = [1, 1]} : vector<8x384xf32> to vector<8x128xf32>
    %142 = arith.addf %140, %141 : vector<8x128xf32>
    %143 = arith.negf %142 : vector<8x128xf32>
    %144 = math.exp %143 : vector<8x128xf32>
    %cst_35 = arith.constant 1.000000e+00 : f32
    %145 = vector.broadcast %cst_35 : f32 to vector<8x128xf32>
    %146 = arith.addf %145, %144 : vector<8x128xf32>
    %147 = arith.divf %145, %146 : vector<8x128xf32>
    %148 = vector.extract_strided_slice %137 {offsets = [0, 128], sizes = [8, 128], strides = [1, 1]} : vector<8x384xf32> to vector<8x128xf32>
    %149 = vector.extract_strided_slice %139 {offsets = [0, 128], sizes = [8, 128], strides = [1, 1]} : vector<8x384xf32> to vector<8x128xf32>
    %150 = arith.addf %148, %149 : vector<8x128xf32>
    %151 = arith.negf %150 : vector<8x128xf32>
    %152 = math.exp %151 : vector<8x128xf32>
    %cst_36 = arith.constant 1.000000e+00 : f32
    %153 = vector.broadcast %cst_36 : f32 to vector<8x128xf32>
    %154 = arith.addf %153, %152 : vector<8x128xf32>
    %155 = arith.divf %153, %154 : vector<8x128xf32>
    %156 = vector.extract_strided_slice %137 {offsets = [0, 256], sizes = [8, 128], strides = [1, 1]} : vector<8x384xf32> to vector<8x128xf32>
    %157 = vector.extract_strided_slice %139 {offsets = [0, 256], sizes = [8, 128], strides = [1, 1]} : vector<8x384xf32> to vector<8x128xf32>
    %158 = arith.mulf %147, %157 : vector<8x128xf32>
    %159 = arith.addf %156, %158 : vector<8x128xf32>
    %160 = math.tanh %159 : vector<8x128xf32>
    %161 = arith.subf %133, %160 : vector<8x128xf32>
    %162 = arith.mulf %155, %161 : vector<8x128xf32>
    %163 = arith.addf %160, %162 : vector<8x128xf32>
    %c5_i32 = arith.constant 5 : i32
    %c8_i32_37 = arith.constant 8 : i32
    %164 = arith.muli %c5_i32, %c8_i32_37 : i32
    %165 = tpu.assume_multiple %164, 8 : i32
    %166 = arith.index_cast %165 : i32 to index
    %c0_38 = arith.constant 0 : index
    %167 = vector.load %arg11[%166, %c0_38] : memref<64x384xf32, #tpu.memory_space<vmem>>, vector<8x384xf32>
    %cst_39 = arith.constant dense<0.000000e+00> : vector<8x384xf32>
    %168 = tpu.matmul %163, %7, %cst_39 {dimension_numbers = #tpu.dot_dimension_numbers<[1], [0], [0], [1], [0, 0, 1, 1], [], []>} : vector<8x128xf32>, vector<128x384xf32>, vector<8x384xf32> -> vector<8x384xf32>
    %169 = arith.addf %168, %10 : vector<8x384xf32>
    %170 = vector.extract_strided_slice %167 {offsets = [0, 0], sizes = [8, 128], strides = [1, 1]} : vector<8x384xf32> to vector<8x128xf32>
    %171 = vector.extract_strided_slice %169 {offsets = [0, 0], sizes = [8, 128], strides = [1, 1]} : vector<8x384xf32> to vector<8x128xf32>
    %172 = arith.addf %170, %171 : vector<8x128xf32>
    %173 = arith.negf %172 : vector<8x128xf32>
    %174 = math.exp %173 : vector<8x128xf32>
    %cst_40 = arith.constant 1.000000e+00 : f32
    %175 = vector.broadcast %cst_40 : f32 to vector<8x128xf32>
    %176 = arith.addf %175, %174 : vector<8x128xf32>
    %177 = arith.divf %175, %176 : vector<8x128xf32>
    %178 = vector.extract_strided_slice %167 {offsets = [0, 128], sizes = [8, 128], strides = [1, 1]} : vector<8x384xf32> to vector<8x128xf32>
    %179 = vector.extract_strided_slice %169 {offsets = [0, 128], sizes = [8, 128], strides = [1, 1]} : vector<8x384xf32> to vector<8x128xf32>
    %180 = arith.addf %178, %179 : vector<8x128xf32>
    %181 = arith.negf %180 : vector<8x128xf32>
    %182 = math.exp %181 : vector<8x128xf32>
    %cst_41 = arith.constant 1.000000e+00 : f32
    %183 = vector.broadcast %cst_41 : f32 to vector<8x128xf32>
    %184 = arith.addf %183, %182 : vector<8x128xf32>
    %185 = arith.divf %183, %184 : vector<8x128xf32>
    %186 = vector.extract_strided_slice %167 {offsets = [0, 256], sizes = [8, 128], strides = [1, 1]} : vector<8x384xf32> to vector<8x128xf32>
    %187 = vector.extract_strided_slice %169 {offsets = [0, 256], sizes = [8, 128], strides = [1, 1]} : vector<8x384xf32> to vector<8x128xf32>
    %188 = arith.mulf %177, %187 : vector<8x128xf32>
    %189 = arith.addf %186, %188 : vector<8x128xf32>
    %190 = math.tanh %189 : vector<8x128xf32>
    %191 = arith.subf %163, %190 : vector<8x128xf32>
    %192 = arith.mulf %185, %191 : vector<8x128xf32>
    %193 = arith.addf %190, %192 : vector<8x128xf32>
    %c6_i32 = arith.constant 6 : i32
    %c8_i32_42 = arith.constant 8 : i32
    %194 = arith.muli %c6_i32, %c8_i32_42 : i32
    %195 = tpu.assume_multiple %194, 8 : i32
    %196 = arith.index_cast %195 : i32 to index
    %c0_43 = arith.constant 0 : index
    %197 = vector.load %arg11[%196, %c0_43] : memref<64x384xf32, #tpu.memory_space<vmem>>, vector<8x384xf32>
    %cst_44 = arith.constant dense<0.000000e+00> : vector<8x384xf32>
    %198 = tpu.matmul %193, %7, %cst_44 {dimension_numbers = #tpu.dot_dimension_numbers<[1], [0], [0], [1], [0, 0, 1, 1], [], []>} : vector<8x128xf32>, vector<128x384xf32>, vector<8x384xf32> -> vector<8x384xf32>
    %199 = arith.addf %198, %10 : vector<8x384xf32>
    %200 = vector.extract_strided_slice %197 {offsets = [0, 0], sizes = [8, 128], strides = [1, 1]} : vector<8x384xf32> to vector<8x128xf32>
    %201 = vector.extract_strided_slice %199 {offsets = [0, 0], sizes = [8, 128], strides = [1, 1]} : vector<8x384xf32> to vector<8x128xf32>
    %202 = arith.addf %200, %201 : vector<8x128xf32>
    %203 = arith.negf %202 : vector<8x128xf32>
    %204 = math.exp %203 : vector<8x128xf32>
    %cst_45 = arith.constant 1.000000e+00 : f32
    %205 = vector.broadcast %cst_45 : f32 to vector<8x128xf32>
    %206 = arith.addf %205, %204 : vector<8x128xf32>
    %207 = arith.divf %205, %206 : vector<8x128xf32>
    %208 = vector.extract_strided_slice %197 {offsets = [0, 128], sizes = [8, 128], strides = [1, 1]} : vector<8x384xf32> to vector<8x128xf32>
    %209 = vector.extract_strided_slice %199 {offsets = [0, 128], sizes = [8, 128], strides = [1, 1]} : vector<8x384xf32> to vector<8x128xf32>
    %210 = arith.addf %208, %209 : vector<8x128xf32>
    %211 = arith.negf %210 : vector<8x128xf32>
    %212 = math.exp %211 : vector<8x128xf32>
    %cst_46 = arith.constant 1.000000e+00 : f32
    %213 = vector.broadcast %cst_46 : f32 to vector<8x128xf32>
    %214 = arith.addf %213, %212 : vector<8x128xf32>
    %215 = arith.divf %213, %214 : vector<8x128xf32>
    %216 = vector.extract_strided_slice %197 {offsets = [0, 256], sizes = [8, 128], strides = [1, 1]} : vector<8x384xf32> to vector<8x128xf32>
    %217 = vector.extract_strided_slice %199 {offsets = [0, 256], sizes = [8, 128], strides = [1, 1]} : vector<8x384xf32> to vector<8x128xf32>
    %218 = arith.mulf %207, %217 : vector<8x128xf32>
    %219 = arith.addf %216, %218 : vector<8x128xf32>
    %220 = math.tanh %219 : vector<8x128xf32>
    %221 = arith.subf %193, %220 : vector<8x128xf32>
    %222 = arith.mulf %215, %221 : vector<8x128xf32>
    %223 = arith.addf %220, %222 : vector<8x128xf32>
    %c7_i32 = arith.constant 7 : i32
    %c8_i32_47 = arith.constant 8 : i32
    %224 = arith.muli %c7_i32, %c8_i32_47 : i32
    %225 = tpu.assume_multiple %224, 8 : i32
    %226 = arith.index_cast %225 : i32 to index
    %c0_48 = arith.constant 0 : index
    %227 = vector.load %arg11[%226, %c0_48] : memref<64x384xf32, #tpu.memory_space<vmem>>, vector<8x384xf32>
    %cst_49 = arith.constant dense<0.000000e+00> : vector<8x384xf32>
    %228 = tpu.matmul %223, %7, %cst_49 {dimension_numbers = #tpu.dot_dimension_numbers<[1], [0], [0], [1], [0, 0, 1, 1], [], []>} : vector<8x128xf32>, vector<128x384xf32>, vector<8x384xf32> -> vector<8x384xf32>
    %229 = arith.addf %228, %10 : vector<8x384xf32>
    %230 = vector.extract_strided_slice %227 {offsets = [0, 0], sizes = [8, 128], strides = [1, 1]} : vector<8x384xf32> to vector<8x128xf32>
    %231 = vector.extract_strided_slice %229 {offsets = [0, 0], sizes = [8, 128], strides = [1, 1]} : vector<8x384xf32> to vector<8x128xf32>
    %232 = arith.addf %230, %231 : vector<8x128xf32>
    %233 = arith.negf %232 : vector<8x128xf32>
    %234 = math.exp %233 : vector<8x128xf32>
    %cst_50 = arith.constant 1.000000e+00 : f32
    %235 = vector.broadcast %cst_50 : f32 to vector<8x128xf32>
    %236 = arith.addf %235, %234 : vector<8x128xf32>
    %237 = arith.divf %235, %236 : vector<8x128xf32>
    %238 = vector.extract_strided_slice %227 {offsets = [0, 128], sizes = [8, 128], strides = [1, 1]} : vector<8x384xf32> to vector<8x128xf32>
    %239 = vector.extract_strided_slice %229 {offsets = [0, 128], sizes = [8, 128], strides = [1, 1]} : vector<8x384xf32> to vector<8x128xf32>
    %240 = arith.addf %238, %239 : vector<8x128xf32>
    %241 = arith.negf %240 : vector<8x128xf32>
    %242 = math.exp %241 : vector<8x128xf32>
    %cst_51 = arith.constant 1.000000e+00 : f32
    %243 = vector.broadcast %cst_51 : f32 to vector<8x128xf32>
    %244 = arith.addf %243, %242 : vector<8x128xf32>
    %245 = arith.divf %243, %244 : vector<8x128xf32>
    %246 = vector.extract_strided_slice %227 {offsets = [0, 256], sizes = [8, 128], strides = [1, 1]} : vector<8x384xf32> to vector<8x128xf32>
    %247 = vector.extract_strided_slice %229 {offsets = [0, 256], sizes = [8, 128], strides = [1, 1]} : vector<8x384xf32> to vector<8x128xf32>
    %248 = arith.mulf %237, %247 : vector<8x128xf32>
    %249 = arith.addf %246, %248 : vector<8x128xf32>
    %250 = math.tanh %249 : vector<8x128xf32>
    %251 = arith.subf %223, %250 : vector<8x128xf32>
    %252 = arith.mulf %245, %251 : vector<8x128xf32>
    %253 = arith.addf %250, %252 : vector<8x128xf32>
    %c8_i32_52 = arith.constant 8 : i32
    %c0_53 = arith.constant 0 : index
    %c0_54 = arith.constant 0 : index
    %254 = vector.load %arg6[%c0_53, %c0_54] : memref<128x128xf32, #tpu.memory_space<vmem>>, vector<128x128xf32>
    %cst_55 = arith.constant dense<0.000000e+00> : vector<8x128xf32>
    %255 = tpu.matmul %253, %254, %cst_55 {dimension_numbers = #tpu.dot_dimension_numbers<[1], [0], [0], [1], [0, 0, 1, 1], [], []>} : vector<8x128xf32>, vector<128x128xf32>, vector<8x128xf32> -> vector<8x128xf32>
    %c0_56 = arith.constant 0 : index
    %c0_57 = arith.constant 0 : index
    %256 = vector.load %arg7[%c0_56, %c0_57] : memref<1x128xf32, #tpu.memory_space<vmem>>, vector<1x128xf32>
    %257 = vector.broadcast %256 : vector<1x128xf32> to vector<8x128xf32>
    %258 = arith.addf %255, %257 : vector<8x128xf32>
    %cst_58 = arith.constant 0.000000e+00 : f32
    %259 = vector.broadcast %cst_58 : f32 to vector<8x128xf32>
    %260 = arith.maximumf %258, %259 : vector<8x128xf32>
    %c0_59 = arith.constant 0 : index
    %c0_60 = arith.constant 0 : index
    %261 = vector.load %arg8[%c0_59, %c0_60] : memref<128x128xf32, #tpu.memory_space<vmem>>, vector<128x128xf32>
    %cst_61 = arith.constant dense<0.000000e+00> : vector<8x128xf32>
    %262 = tpu.matmul %260, %261, %cst_61 {dimension_numbers = #tpu.dot_dimension_numbers<[1], [0], [0], [1], [0, 0, 1, 1], [], []>} : vector<8x128xf32>, vector<128x128xf32>, vector<8x128xf32> -> vector<8x128xf32>
    %c0_62 = arith.constant 0 : index
    %c0_63 = arith.constant 0 : index
    %263 = vector.load %arg9[%c0_62, %c0_63] : memref<1x128xf32, #tpu.memory_space<vmem>>, vector<1x128xf32>
    %264 = vector.broadcast %263 : vector<1x128xf32> to vector<8x128xf32>
    %265 = arith.addf %262, %264 : vector<8x128xf32>
    %c0_64 = arith.constant 0 : index
    %c0_65 = arith.constant 0 : index
    %266 = vector.load %arg10[%c0_64, %c0_65] : memref<8x128xf32, #tpu.memory_space<vmem>>, vector<8x128xf32>
    tpu.vector_store %arg10[%c0_64, %c0_65], %265 {strides = array<i32>} : memref<8x128xf32, #tpu.memory_space<vmem>>, vector<8x128xf32>,
    return
  }
}

</mosaic_0001>

<bundles_post_ra>
// kernel: tpu_custom_call.1
= control target key start
LH: loop header
LB: loop body
LE: loop exit
PB: predicated region body
PF: predicated region fallthrough
CT: control target
= control target key end

     0   :  { %15 = vsyncpa [#allocation4], 0  ;;  %s2504_s0 = inlined_call_operand.vmem [shape: f32[64,16], index: 0, kind: input, shape index: {}]   ;;  %s2505_s1 = inlined_call_operand.vmem [shape: f32[1,128], index: 1, kind: input, shape index: {}]   ;;  %s2506_s2 = inlined_call_operand.vmem [shape: f32[16,384], index: 2, kind: input, shape index: {}]   ;;  %s2507_s3 = inlined_call_operand.hbm [shape: f32[128,384], index: 3, kind: input, shape index: {}]   ;;  %s2508_s4 = inlined_call_operand.vmem [shape: f32[1,384], index: 4, kind: input, shape index: {}]   ;;  %s2509_s5 = inlined_call_operand.vmem [shape: f32[1,384], index: 5, kind: input, shape index: {}]   ;;  %s2510_s6 = inlined_call_operand.hbm [shape: f32[128,128], index: 6, kind: input, shape index: {}]   ;;  %s2511_s7 = inlined_call_operand.vmem [shape: f32[1,128], index: 7, kind: input, shape index: {}]   ;;  %s2512_s8 = inlined_call_operand.hbm [shape: f32[128,128], index: 8, kind: input, shape index: {}]   ;;  %s2513_s9 = inlined_call_operand.vmem [shape: f32[1,128], index: 9, kind: input, shape index: {}]   ;;  %s2514_s10 = inlined_call_operand.hbm [shape: f32[8,128], index: 10, kind: output, shape index: {}]  }
   0x1   :  { %16 = vsyncpa [#allocation7], 0  ;;  %s45_s15 = sshll.u32 %s2510_s6, 4  ;;  %s46_s15 = int_to_ptr.hbm [resolvable:$true] %s45_s15 }
   0x2   :  { %17 = vsyncpa [#allocation5], 0  ;;  %s1621_s16 = smov [#allocation6]   ;;  %s28_s20 = sshll.u32 %s2507_s3, 4  ;;  %s29_s20 = int_to_ptr.hbm [resolvable:$true] %s28_s20 }
   0x3   :  { %s47_s17 = sshll.u32 %s1621_s16, 4  ;;  %s1622_s21 = smov 128   ;;  %s48_s17 = int_to_ptr.vmem [resolvable:$true] %s47_s17 }
   0x4   :  { %s1623_s22 = smov 8   ;;  %s1624_s23 = smov [#allocation3]  }
   0x5   :  { %53 = dma.hbm_to_vmem [thread:$0]  %s46_s15, 2048, %s48_s17, [#allocation7], %s1622_s21, %s1622_s21, %s1623_s22  }
   0x6   :  { %s30_s24 = sshll.u32 %s1624_s23, 4  ;;  %s1625_s25 = smov 384   ;;  %s31_s24 = int_to_ptr.vmem [resolvable:$true] %s30_s24 }
   0x7   :  { %s1626_s26 = smov 24   ;;  %s60_s28 = sshll.u32 %s2512_s8, 4  ;;  %s61_s28 = int_to_ptr.hbm [resolvable:$true] %s60_s28 }
   0x8   :  { %36 = dma.hbm_to_vmem [thread:$0]  %s29_s20, 6144, %s31_s24, [#allocation4], %s1625_s25, %s1625_s25, %s1626_s26  }
   0x9   :  { %s1627_s29 = smov [#allocation8]  }
   0xa   :  { %s62_s30 = sshll.u32 %s1627_s29, 4  ;;  %s63_s30 = int_to_ptr.vmem [resolvable:$true] %s62_s30 }
   0xb   :  { %68 = dma.hbm_to_vmem [thread:$0]  %s61_s28, 2048, %s63_s30, [#allocation7], %s1622_s21, %s1622_s21, %s1623_s22  }
   0xc   :  { %1615 = dma.done.wait [#allocation4], 6144  }
   0xd   :  { %1616 = vsyncadd [#allocation4], 4294961152 }
   0xe   :  { %1617 = dma.done.wait [#allocation7], 4096  }
   0xf   :  { %1618 = vsyncadd [#allocation7], 4294963200  ;;  %v94_v0 = vld [vmem:[%s2506_s2 + $0x18] sm:$0xff]  ;;  %v1696_v1 = vld [vmem:[#allocation3 + $0x168] sm:$0xff]  ;;  %vm105_vm0 = vcmask 130048   ;;  %s1628_s19 = smov [#allocation9]  }
  0x10   :  { %v91_v2 = vld [vmem:[%s2506_s2] sm:$0xff]  ;;  %144 = vmatpush.msra.mxu0 %v94_v0  ;;  %343 = vmatpush.msra.mxu3 %v1696_v1  ;;  %v1702_v3 = vld [vmem:[#allocation3 + $0x150] sm:$0xff]  ;;  %v1709_v5 = vld [vmem:[#allocation3 + $0x138] sm:$0xff]  ;;  %s1320_s20 = sshll.u32 %s1628_s19, 4  ;;  %s1322_s23 = sshll.u32 %s2514_s10, 4  ;;  %s1321_s20 = int_to_ptr.vmem [resolvable:$true] %s1320_s20  ;;  %s1323_s23 = int_to_ptr.hbm [resolvable:$true] %s1322_s23 }
  0x11   :  { %v1707_v4 = vld [vmem:[%s2504_s0] sm:$0xff]  ;;  %v1717_v7 = vld [vmem:[#allocation3 + $0x178] sm:$0xff]  ;;  %v1719_v8 = vld [vmem:[#allocation3 + $0x108] sm:$0xff] }
  0x12   :  { %145 = vmatpush.msra.mxu0 %v91_v2  ;;  %344 = vmatpush.msra.mxu3 %v1702_v3  ;;  %v1714_v6 = vld [vmem:[#allocation3 + $0x120] sm:$0xff]  ;;  %v1725_v10 = vld [vmem:[#allocation3 + $0x148] sm:$0xff]  ;;  %v1727_v11 = vld [vmem:[#allocation3 + $0xf0] sm:$0xff] }
  0x13   :  { %1340 = vmatmul.msk.f32.vlgmr.msra.gmra.mxu0 %vm105_vm0, %v1707_v4  ;;  %v1722_v9 = vld [vmem:[#allocation3 + $0x160] sm:$0xff]  ;;  %v1734_v12 = vld [vmem:[%s2504_s0 + $0x8] sm:$0xff]  ;;  %v1736_v13 = vld [vmem:[#allocation3 + $0xd8] sm:$0xff] }
  0x14   :  { %345 = vmatpush.msra.mxu3 %v1709_v5  ;;  %383 = vmatpush.msrb.mxu0 %v1717_v7  ;;  %v1739_v14 = vld [vmem:[#allocation3 + $0x130] sm:$0xff]  ;;  %v1744_v15 = vld [vmem:[#allocation3 + $0xc0] sm:$0xff]  ;;  %v1746_v16 = vld [vmem:[#allocation3 + $0x118] sm:$0xff] }
  0x15   :  { %v1750_v17 = vld [vmem:[#allocation3 + $0xa8] sm:$0xff]  ;;  %v1752_v18 = vld [vmem:[#allocation3 + $0x100] sm:$0xff]  ;;  %v1756_v19 = vld [vmem:[#allocation3 + $0x90] sm:$0xff] }
  0x16   :  { %346 = vmatpush.msra.mxu3 %v1714_v6  ;;  %384 = vmatpush.msrb.mxu0 %v1722_v9  ;;  %v1758_v20 = vld [vmem:[#allocation3 + $0xe8] sm:$0xff]  ;;  %v1764_v21 = vld [vmem:[%s2504_s0 + $0x10] sm:$0xff]  ;;  %v1767_v22 = vld [vmem:[#allocation3 + $0x78] sm:$0xff] }
  0x17   :  { %v1771_v23 = vld [vmem:[#allocation3 + $0xd0] sm:$0xff]  ;;  %v1775_v24 = vld [vmem:[#allocation3 + $0x60] sm:$0xff]  ;;  %v1779_v25 = vld [vmem:[#allocation3 + $0xb8] sm:$0xff] }
  0x18   :  { %347 = vmatpush.msra.mxu3 %v1719_v8  ;;  %385 = vmatpush.msrb.mxu0 %v1725_v10  ;;  %v1781_v26 = vld [vmem:[#allocation3 + $0x48] sm:$0xff]  ;;  %v1785_v27 = vld [vmem:[#allocation3 + $0xa0] sm:$0xff]  ;;  %v1787_v28 = vld [vmem:[#allocation3 + $0x30] sm:$0xff] }
  0x19   :  { %2537 = vst [vmem:[#allocation13_spill] sm:$0xff] %v1787_v28  ;;  %v1793_v29 = vld [vmem:[%s2504_s0 + $0x18] sm:$0xff]  ;;  %v1796_v30 = vld [vmem:[#allocation3 + $0x88] sm:$0xff]  ;;  %v1802_v32 = vld [vmem:[#allocation3 + $0x70] sm:$0xff] }
  0x1a   :  { %348 = vmatpush.msra.mxu3 %v1727_v11  ;;  %386 = vmatpush.msrb.mxu0 %v1739_v14  ;;  %v1798_v31 = vld [vmem:[#allocation3 + $0x18] sm:$0xff]  ;;  %v1806_v33 = vld [vmem:[#allocation3] sm:$0xff]  ;;  %v96_v35 = vld [vmem:[%s2506_s2 + $0x28] sm:$0xff] }
  0x1b   :  { %1341 = vmatmul.msk.f32.gmra.mxu0 %vm105_vm0, %v1734_v12  ;;  %2538 = vst [vmem:[#allocation14_spill] sm:$0xff] %v1798_v31  ;;  %v1811_v34 = vld [vmem:[%s2505_s1] ss:$0 sm:$0xff]  ;;  %v1818_v36 = vld [vmem:[#allocation3 + $0x58] sm:$0xff]  ;;  %v1820_v37 = vld [vmem:[#allocation3 + $0x170] sm:$0xff]  ;;  %226 = vmatpush.msra.mxu2 %v96_v35 }
  0x1c   :  { %349 = vmatpush.msra.mxu3 %v1736_v13  ;;  %387 = vmatpush.msrb.mxu0 %v1746_v16  ;;  %2539 = vst [vmem:[#allocation15_spill] sm:$0xff] %v1806_v33  ;;  %v93_v38 = vld [vmem:[%s2506_s2 + $0x10] sm:$0xff]  ;;  %v1827_v39 = vld [vmem:[#allocation3 + $0x40] sm:$0xff]  ;;  %v1830_v40 = vld [vmem:[#allocation3 + $0x158] sm:$0xff] }
  0x1d   :  { %2540 = vst [vmem:[#allocation16_spill] sm:$0xff] %v1827_v39  ;;  %227 = vmatpush.msra.mxu2 %v93_v38  ;;  %v1832_v41 = vld [vmem:[#allocation3 + $0x28] sm:$0xff]  ;;  %v95_v42 = vld [vmem:[%s2506_s2 + $0x20] sm:$0xff]  ;;  %v1851_v46 = vld [vmem:[#allocation3 + $0x10] sm:$0xff] }
  0x1e   :  { %350 = vmatpush.msra.mxu3 %v1744_v15  ;;  %388 = vmatpush.msrb.mxu0 %v1752_v18  ;;  %2541 = vst [vmem:[#allocation17_spill] sm:$0xff] %v1832_v41  ;;  %v1841_v43 = vld [vmem:[%s2504_s0 + $0x20] sm:$0xff]  ;;  %v92_v44 = vld [vmem:[%s2506_s2 + $0x8] sm:$0xff]  ;;  %v1861_v48 = vld [vmem:[#allocation3 + $0x110] sm:$0xff] }
  0x1f   :  { %v1847_v45 = vld [vmem:[#allocation3 + $0x140] sm:$0xff]  ;;  %1356 = vmatmul.msk.f32.vlgmr.msra.gmra.mxu2 %vm105_vm0, %v1707_v4  ;;  %185 = vmatpush.msra.mxu1 %v95_v42  ;;  %2542 = vst [vmem:[#allocation18_spill] sm:$0xff] %v1851_v46  ;;  %v1857_v47 = vld [vmem:[#allocation3 + $0x128] sm:$0xff]  ;;  %v1868_v49 = vld [vmem:[#allocation3 + $0xf8] sm:$0xff] }
  0x20   :  { %351 = vmatpush.msra.mxu3 %v1750_v17  ;;  %389 = vmatpush.msrb.mxu0 %v1758_v20  ;;  %v1876_v50 = vld [vmem:[%s2504_s0 + $0x28] sm:$0xff]  ;;  %v1879_v51 = vld [vmem:[#allocation3 + $0xe0] sm:$0xff]  ;;  %v1893_v53 = vld [vmem:[#allocation3 + $0xb0] sm:$0xff] }
  0x21   :  { %186 = vmatpush.msra.mxu1 %v92_v44  ;;  %475 = vmatpush.msrb.mxu2 %v1820_v37  ;;  %v1888_v52 = vld [vmem:[#allocation3 + $0xc8] sm:$0xff]  ;;  %v1900_v54 = vld [vmem:[#allocation3 + $0x98] sm:$0xff]  ;;  %v1908_v55 = vld [vmem:[%s2504_s0 + $0x30] sm:$0xff] }
  0x22   :  { %352 = vmatpush.msra.mxu3 %v1756_v19  ;;  %390 = vmatpush.msrb.mxu0 %v1771_v23  ;;  %v1911_v56 = vld [vmem:[#allocation3 + $0x80] sm:$0xff]  ;;  %v1920_v57 = vld [vmem:[#allocation3 + $0x68] sm:$0xff]  ;;  %v1925_v58 = vld [vmem:[#allocation3 + $0x50] sm:$0xff] }
  0x23   :  { %1342 = vmatmul.msk.f32.gmra.mxu0 %vm105_vm0, %v1764_v21  ;;  %1348 = vmatmul.msk.f32.vlgmr.msra.gmra.mxu1 %vm105_vm0, %v1707_v4  ;;  %v1932_v59 = vld [vmem:[#allocation3 + $0x38] sm:$0xff]  ;;  %v1943_v61 = vld [vmem:[#allocation3 + $0x20] sm:$0xff]  ;;  %v1952_v62 = vld [vmem:[#allocation3 + $0x8] sm:$0xff] }
  0x24   :  { %353 = vmatpush.msra.mxu3 %v1767_v22  ;;  %391 = vmatpush.msrb.mxu0 %v1779_v25  ;;  %2543 = vst [vmem:[#allocation19_spill] sm:$0xff] %v1932_v59  ;;  %v1940_v60 = vld [vmem:[%s2504_s0 + $0x38] sm:$0xff]  ;;  %v97_v0 = vld [vmem:[%s2508_s4] sm:$0x7] }
  0x25   :  { %455 = vmatpush.msrb.mxu1 %v1696_v1  ;;  %476 = vmatpush.msrb.mxu2 %v1830_v40  ;;  %2544 = vst [vmem:[#allocation20_spill] sm:$0xff] %v1943_v61  ;;  %v99_v2 = vperm.slane %v97_v0, 0  ;;  %v325_v42 = vld [vmem:[%s2509_s5] sm:$0x7] }
  0x26   :  { %354 = vmatpush.msra.mxu3 %v1775_v24  ;;  %392 = vmatpush.msrb.mxu0 %v1785_v27  ;;  %2545 = vst [vmem:[#allocation21_spill] sm:$0xff] %v1952_v62 }
  0x27   :  { %456 = vmatpush.msrb.mxu1 %v1702_v3  ;;  %1357 = vmatmul.msk.f32.gmra.mxu2 %vm105_vm0, %v1734_v12 }
  0x28   :  { %355 = vmatpush.msra.mxu3 %v1781_v26  ;;  %393 = vmatpush.msrb.mxu0 %v1796_v30 }
  0x29   :  { %457 = vmatpush.msrb.mxu1 %v1709_v5  ;;  %477 = vmatpush.msrb.mxu2 %v1847_v45 }
  0x2a   :  { %356 = vmatpush.msra.mxu3 %v1787_v28  ;;  %394 = vmatpush.msrb.mxu0 %v1802_v32 }
  0x2b   :  { %1343 = vmatmul.msk.f32.gmra.mxu0 %vm105_vm0, %v1793_v29  ;;  %458 = vmatpush.msrb.mxu1 %v1714_v6 }
  0x2c   :  { %357 = vmatpush.msra.mxu3 %v1798_v31  ;;  %395 = vmatpush.msrb.mxu0 %v1818_v36 }
  0x2d   :  { %1349 = vmatmul.msk.f32.gmra.mxu1 %vm105_vm0, %v1734_v12  ;;  %478 = vmatpush.msrb.mxu2 %v1857_v47 }
  0x2e   :  { %358 = vmatpush.msra.mxu3 %v1806_v33  ;;  %396 = vmatpush.msrb.mxu0 %v1827_v39 }
  0x2f   :  { %359 = vmatmul.f32.vlgmr.msra.gmra.mxu3 %v1811_v34  ;;  %459 = vmatpush.msrb.mxu1 %v1719_v8 }
  0x30   :  { %363 = vmatpush.msrb.mxu3 %v1820_v37  ;;  %397 = vmatpush.msrb.mxu0 %v1832_v41 }
  0x31   :  { %479 = vmatpush.msrb.mxu2 %v1861_v48  ;;  %460 = vmatpush.msrb.mxu1 %v1727_v11 }
  0x32   :  { %364 = vmatpush.msrb.mxu3 %v1830_v40  ;;  %398 = vmatpush.msrb.mxu0 %v1851_v46 }
  0x33   :  { %1344 = vmatmul.msk.f32.gmra.mxu0 %vm105_vm0, %v1841_v43  ;;  %1358 = vmatmul.msk.f32.gmra.mxu2 %vm105_vm0, %v1764_v21 }
  0x34   :  { %365 = vmatpush.msrb.mxu3 %v1847_v45  ;;  %567 = vmatpush.msra.mxu0 %v1696_v1 }
  0x35   :  { %461 = vmatpush.msrb.mxu1 %v1736_v13  ;;  %480 = vmatpush.msrb.mxu2 %v1868_v49 }
  0x36   :  { %366 = vmatpush.msrb.mxu3 %v1857_v47  ;;  %568 = vmatpush.msra.mxu0 %v1702_v3 }
  0x37   :  { %462 = vmatpush.msrb.mxu1 %v1744_v15  ;;  %481 = vmatpush.msrb.mxu2 %v1879_v51 }
  0x38   :  { %367 = vmatpush.msrb.mxu3 %v1861_v48  ;;  %569 = vmatpush.msra.mxu0 %v1709_v5 }
  0x39   :  { %1350 = vmatmul.msk.f32.gmra.mxu1 %vm105_vm0, %v1764_v21  ;;  %482 = vmatpush.msrb.mxu2 %v1888_v52 }
  0x3a   :  { %368 = vmatpush.msrb.mxu3 %v1868_v49  ;;  %570 = vmatpush.msra.mxu0 %v1714_v6 }
  0x3b   :  { %1345 = vmatmul.msk.f32.gmra.mxu0 %vm105_vm0, %v1876_v50  ;;  %463 = vmatpush.msrb.mxu1 %v1750_v17 }
  0x3c   :  { %369 = vmatpush.msrb.mxu3 %v1879_v51  ;;  %571 = vmatpush.msra.mxu0 %v1719_v8 }
  0x3d   :  { %464 = vmatpush.msrb.mxu1 %v1756_v19  ;;  %1359 = vmatmul.msk.f32.gmra.mxu2 %vm105_vm0, %v1793_v29 }
  0x3e   :  { %370 = vmatpush.msrb.mxu3 %v1888_v52  ;;  %572 = vmatpush.msra.mxu0 %v1727_v11 }
  0x3f   :  { %483 = vmatpush.msrb.mxu2 %v1893_v53  ;;  %465 = vmatpush.msrb.mxu1 %v1767_v22 }
  0x40   :  { %371 = vmatpush.msrb.mxu3 %v1893_v53  ;;  %573 = vmatpush.msra.mxu0 %v1736_v13 }
  0x41   :  { %484 = vmatpush.msrb.mxu2 %v1900_v54  ;;  %1351 = vmatmul.msk.f32.gmra.mxu1 %vm105_vm0, %v1793_v29 }
  0x42   :  { %372 = vmatpush.msrb.mxu3 %v1900_v54  ;;  %466 = vmatpush.msrb.mxu1 %v1775_v24 }
  0x43   :  { %1346 = vmatmul.msk.f32.gmra.mxu0 %vm105_vm0, %v1908_v55  ;;  %485 = vmatpush.msrb.mxu2 %v1911_v56 }
  0x44   :  { %373 = vmatpush.msrb.mxu3 %v1911_v56  ;;  %467 = vmatpush.msrb.mxu1 %v1781_v26 }
  0x45   :  { %1360 = vmatmul.msk.f32.gmra.mxu2 %vm105_vm0, %v1841_v43  ;;  %574 = vmatpush.msra.mxu0 %v1744_v15 }
  0x46   :  { %374 = vmatpush.msrb.mxu3 %v1920_v57  ;;  %486 = vmatpush.msrb.mxu2 %v1920_v57 }
  0x47   :  { %468 = vmatpush.msrb.mxu1 %v1787_v28  ;;  %575 = vmatpush.msra.mxu0 %v1750_v17 }
  0x48   :  { %375 = vmatpush.msrb.mxu3 %v1925_v58  ;;  %487 = vmatpush.msrb.mxu2 %v1925_v58 }
  0x49   :  { %1352 = vmatmul.msk.f32.gmra.mxu1 %vm105_vm0, %v1841_v43  ;;  %576 = vmatpush.msra.mxu0 %v1756_v19  ;;  %v2091_v43 = vperm.slane %v325_v42, 0 }
  0x4a   :  { %376 = vmatpush.msrb.mxu3 %v1932_v59  ;;  %469 = vmatpush.msrb.mxu1 %v1798_v31 }
  0x4b   :  { %1347 = vmatmul.msk.f32.gmra.mxu0 %vm105_vm0, %v1940_v60  ;;  %488 = vmatpush.msrb.mxu2 %v1932_v59  ;;  %2549 = vst [vmem:[#allocation25_spill] sm:$0xff] %v2091_v43 }
  0x4c   :  { %377 = vmatpush.msrb.mxu3 %v1943_v61  ;;  %470 = vmatpush.msrb.mxu1 %v1806_v33 }
  0x4d   :  { %1361 = vmatmul.msk.f32.gmra.mxu2 %vm105_vm0, %v1876_v50  ;;  %577 = vmatpush.msra.mxu0 %v1767_v22 }
  0x4e   :  { %378 = vmatpush.msrb.mxu3 %v1952_v62  ;;  %587 = vmatpush.msra.mxu1 %v1820_v37 }
  0x4f   :  { %379 = vmatmul.f32.vlgmr.msrb.gmra.mxu3 %v1811_v34  ;;  %489 = vmatpush.msrb.mxu2 %v1943_v61 }
  0x50   :  { %495 = vmatpush.msra.mxu3 %v1717_v7  ;;  %588 = vmatpush.msra.mxu1 %v1830_v40 }
  0x51   :  { %490 = vmatpush.msrb.mxu2 %v1952_v62  ;;  %1353 = vmatmul.msk.f32.gmra.mxu1 %vm105_vm0, %v1876_v50 }
  0x52   :  { %496 = vmatpush.msra.mxu3 %v1722_v9  ;;  %589 = vmatpush.msra.mxu1 %v1847_v45 }
  0x53   :  { %399 = vmatmul.f32.vlgmr.msrb.gmra.mxu0 %v1811_v34  ;;  %607 = vmatpush.msra.mxu2 %v1717_v7 }
  0x54   :  { %497 = vmatpush.msra.mxu3 %v1725_v10  ;;  %578 = vmatpush.msra.mxu0 %v1775_v24 }
  0x55   :  { %608 = vmatpush.msra.mxu2 %v1722_v9  ;;  %590 = vmatpush.msra.mxu1 %v1857_v47 }
  0x56   :  { %498 = vmatpush.msra.mxu3 %v1739_v14  ;;  %1362 = vmatmul.msk.f32.gmra.mxu2 %vm105_vm0, %v1908_v55 }
  0x57   :  { %579 = vmatpush.msra.mxu0 %v1781_v26  ;;  %609 = vmatpush.msra.mxu2 %v1725_v10 }
  0x58   :  { %499 = vmatpush.msra.mxu3 %v1746_v16  ;;  %591 = vmatpush.msra.mxu1 %v1861_v48 }
  0x59   :  { %580 = vmatpush.msra.mxu0 %v1787_v28  ;;  %610 = vmatpush.msra.mxu2 %v1739_v14 }
  0x5a   :  { %500 = vmatpush.msra.mxu3 %v1752_v18  ;;  %1354 = vmatmul.msk.f32.gmra.mxu1 %vm105_vm0, %v1908_v55 }
  0x5b   :  { %581 = vmatpush.msra.mxu0 %v1798_v31  ;;  %611 = vmatpush.msra.mxu2 %v1746_v16 }
  0x5c   :  { %501 = vmatpush.msra.mxu3 %v1758_v20  ;;  %592 = vmatpush.msra.mxu1 %v1868_v49 }
  0x5d   :  { %582 = vmatpush.msra.mxu0 %v1806_v33  ;;  %612 = vmatpush.msra.mxu2 %v1752_v18 }
  0x5e   :  { %502 = vmatpush.msra.mxu3 %v1771_v23  ;;  %1363 = vmatmul.msk.f32.gmra.mxu2 %vm105_vm0, %v1940_v60 }
  0x5f   :  { %593 = vmatpush.msra.mxu1 %v1879_v51  ;;  %613 = vmatpush.msra.mxu2 %v1758_v20 }
  0x60   :  { %503 = vmatpush.msra.mxu3 %v1779_v25  ;;  %699 = vmatpush.msrb.mxu0 %v1820_v37 }
  0x61   :  { %594 = vmatpush.msra.mxu1 %v1888_v52  ;;  %614 = vmatpush.msra.mxu2 %v1771_v23 }
  0x62   :  { %504 = vmatpush.msra.mxu3 %v1785_v27  ;;  %1355 = vmatmul.msk.f32.gmra.mxu1 %vm105_vm0, %v1940_v60 }
  0x63   :  { %700 = vmatpush.msrb.mxu0 %v1830_v40  ;;  %595 = vmatpush.msra.mxu1 %v1893_v53 }
  0x64   :  { %505 = vmatpush.msra.mxu3 %v1796_v30  ;;  %615 = vmatpush.msra.mxu2 %v1779_v25 }
  0x65   :  { %596 = vmatpush.msra.mxu1 %v1900_v54  ;;  %701 = vmatpush.msrb.mxu0 %v1847_v45 }
  0x66   :  { %506 = vmatpush.msra.mxu3 %v1802_v32  ;;  %616 = vmatpush.msra.mxu2 %v1785_v27 }
  0x67   :  { %597 = vmatpush.msra.mxu1 %v1911_v56  ;;  %702 = vmatpush.msrb.mxu0 %v1857_v47 }
  0x68   :  { %507 = vmatpush.msra.mxu3 %v1818_v36  ;;  %617 = vmatpush.msra.mxu2 %v1796_v30 }
  0x69   :  { %598 = vmatpush.msra.mxu1 %v1920_v57  ;;  %703 = vmatpush.msrb.mxu0 %v1861_v48 }
  0x6a   :  { %508 = vmatpush.msra.mxu3 %v1827_v39  ;;  %618 = vmatpush.msra.mxu2 %v1802_v32 }
  0x6b   :  { %599 = vmatpush.msra.mxu1 %v1925_v58  ;;  %704 = vmatpush.msrb.mxu0 %v1868_v49 }
  0x6c   :  { %509 = vmatpush.msra.mxu3 %v1832_v41  ;;  %619 = vmatpush.msra.mxu2 %v1818_v36 }
  0x6d   :  { %600 = vmatpush.msra.mxu1 %v1932_v59  ;;  %705 = vmatpush.msrb.mxu0 %v1879_v51 }
  0x6e   :  { %510 = vmatpush.msra.mxu3 %v1851_v46  ;;  %620 = vmatpush.msra.mxu2 %v1827_v39 }
  0x6f   :  { %601 = vmatpush.msra.mxu1 %v1943_v61  ;;  %706 = vmatpush.msrb.mxu0 %v1888_v52 }
  0x70   :  { %679 = vmatpush.msrb.mxu3 %v1696_v1  ;;  %621 = vmatpush.msra.mxu2 %v1832_v41 }
  0x71   :  { %602 = vmatpush.msra.mxu1 %v1952_v62  ;;  %707 = vmatpush.msrb.mxu0 %v1893_v53 }
  0x72   :  { %680 = vmatpush.msrb.mxu3 %v1702_v3  ;;  %622 = vmatpush.msra.mxu2 %v1851_v46 }
  0x73   :  { %708 = vmatpush.msrb.mxu0 %v1900_v54 }
  0x74   :  { %681 = vmatpush.msrb.mxu3 %v1709_v5 }
  0x75   :  { %709 = vmatpush.msrb.mxu0 %v1911_v56 }
  0x76   :  { %682 = vmatpush.msrb.mxu3 %v1714_v6 }
  0x77   :  { %710 = vmatpush.msrb.mxu0 %v1920_v57 }
  0x78   :  { %683 = vmatpush.msrb.mxu3 %v1719_v8 }
  0x79   :  { %711 = vmatpush.msrb.mxu0 %v1925_v58 }
  0x7a   :  { %684 = vmatpush.msrb.mxu3 %v1727_v11 }
  0x7b   :  { %712 = vmatpush.msrb.mxu0 %v1932_v59 }
  0x7c   :  { %685 = vmatpush.msrb.mxu3 %v1736_v13 }
  0x7d   :  { %713 = vmatpush.msrb.mxu0 %v1943_v61 }
  0x7e   :  { %686 = vmatpush.msrb.mxu3 %v1744_v15 }
  0x7f   :  { %714 = vmatpush.msrb.mxu0 %v1952_v62 }
  0x80   :  { %687 = vmatpush.msrb.mxu3 %v1750_v17 }
  0x82   :  { %688 = vmatpush.msrb.mxu3 %v1756_v19 }
  0x84   :  { %689 = vmatpush.msrb.mxu3 %v1767_v22 }
  0x86   :  { %690 = vmatpush.msrb.mxu3 %v1775_v24 }
  0x88   :  { %691 = vmatpush.msrb.mxu3 %v1781_v26 }
  0x8a   :  { %692 = vmatpush.msrb.mxu3 %v1787_v28 }
  0x8c   :  { %693 = vmatpush.msrb.mxu3 %v1798_v31 }
  0x8e   :  { %694 = vmatpush.msrb.mxu3 %v1806_v33 }
  0x90   :  { %v147_v63 = vpop.f32.mrf.mxu0 }
  0x91   :  { %v148_v60 = vadd.f32 %v147_v63, %v99_v2  ;;  %v2102_v63 = vperm.slane %v97_v0, 1 }
  0x93   :  { %2554 = vst [vmem:[#allocation30_spill] sm:$0xff] %v2102_v63 }
  0x98   :  { %v150_v4 = vpop.f32.mrf.mxu0 }
  0x99   :  { %v2082_v12 = vadd.f32 %v150_v4, %v99_v2 }
  0x9b   :  { %2546 = vst [vmem:[#allocation22_spill] sm:$0xff] %v2082_v12 }
  0xa0   :  { %v153_v21 = vpop.f32.mrf.mxu0 }
  0xa1   :  { %v2084_v29 = vadd.f32 %v153_v21, %v99_v2 }
  0xa3   :  { %2547 = vst [vmem:[#allocation23_spill] sm:$0xff] %v2084_v29 }
  0xa8   :  { %v156_v35 = vpop.f32.mrf.mxu0 }
  0xa9   :  { %v2086_v38 = vadd.f32 %v156_v35, %v99_v2 }
  0xab   :  { %2548 = vst [vmem:[#allocation24_spill] sm:$0xff] %v2086_v38 }
  0xb0   :  { %v159_v44 = vpop.f32.mrf.mxu0 }
  0xb1   :  { %v2093_v50 = vadd.f32 %v159_v44, %v99_v2 }
  0xb2   :  { %v360_v55 = vpop.f32.mrf.mxu3 }
  0xb3   :  { %2550 = vst [vmem:[#allocation26_spill] sm:$0xff] %v2093_v50  ;;  %v361_v4 = vadd.f32 %v360_v55, %v2091_v43 }
  0xb5   :  { %v403_v12 = vadd.f32 %v361_v4, %v148_v60  ;;  %v188_v60 = vpop.f32.mrf.mxu1 }
  0xb7   :  { %v1364_v62 = vmul.f32 -1.442695, %v403_v12  ;;  %v2104_v12 = vperm.slane %v325_v42, 1 }
  0xb8   :  { %v162_v21 = vpop.f32.mrf.mxu0 }
  0xb9   :  { %1391 = vpow2.f32 %v1364_v62  ;;  %v2096_v29 = vadd.f32 %v162_v21, %v99_v2  ;;  %2555 = vst [vmem:[#allocation31_spill] sm:$0xff] %v2104_v12  ;;  %v189_v62 = vadd.f32 %v188_v60, %v2102_v63 }
  0xbb   :  { %2551 = vst [vmem:[#allocation27_spill] sm:$0xff] %v2096_v29 }
  0xbf   :  { %v1392_v35 = vpop.eup %1391 }
  0xc0   :  { %v407_v38 = vadd.f32 1.0, %v1392_v35  ;;  %v165_v33 = vpop.f32.mrf.mxu0 }
  0xc1   :  { %v2098_v46 = vadd.f32 %v165_v33, %v99_v2 }
  0xc2   :  { %1393 = vrcp.f32 %v407_v38  ;;  %v419_v29 = vand.u32 2147483648, %v407_v38  ;;  %vm413_vm2 = vweird.f32 %v407_v38 }
  0xc3   :  { %2552 = vst [vmem:[#allocation28_spill] sm:$0xff] %v2098_v46 }
  0xc4   :  { %v420_v41 = vor.u32 1.1754944e-38, %v419_v29 }
  0xc8   :  { %v1394_v61 = vpop.eup %1393  ;;  %v168_v31 = vpop.f32.mrf.mxu0 }
  0xc9   :  { %v2100_v44 = vadd.f32 %v168_v31, %v99_v2  ;;  %v409_v50 = vmul.f32 %v1394_v61, %v407_v38  ;;  %vm414_vm1 = vweird.f32 %v1394_v61  ;;  %v2108_v31 = vperm.slane %v325_v42, 2 }
  0xca   :  { %v417_v2 = vand.u32 2147483647, %v407_v38  ;;  %vm415_vm3 = vmor %vm413_vm2, %vm414_vm1 }
  0xcb   :  { %2553 = vst [vmem:[#allocation29_spill] sm:$0xff] %v2100_v44  ;;  %v410_v55 = vsub.f32 1.0, %v409_v50 }
  0xcc   :  { %vm418_vm4 = vcmp.eq.f32.partialorder %v417_v2, 8.507059e+37 }
  0xcd   :  { %v411_v4 = vmul.f32 %v1394_v61, %v410_v55  ;;  %v2111_v55 = vperm.slane %v97_v0, 2 }
  0xcf   :  { %v412_v46 = vadd.f32 %v1394_v61, %v411_v4 }
  0xd0   :  { %v400_v44 = vpop.f32.mrf.mxu0 }
  0xd1   :  { %v416_v50 = vsel %vm415_vm3, %v1394_v61, %v412_v46  ;;  %v401_v60 = vadd.f32 %v400_v44, %v2108_v31 }
  0xd2   :  { %v380_v21 = vpop.f32.mrf.mxu3 }
  0xd3   :  { %v381_v35 = vadd.f32 %v380_v21, %v2104_v12  ;;  %v421_v21 = vsel %vm418_vm4, %v420_v41, %v416_v50 }
  0xd5   :  { %v423_v33 = vadd.f32 %v381_v35, %v189_v62  ;;  %v229_v62 = vpop.f32.mrf.mxu2  ;;  %v443_v35 = vmul.f32 %v421_v21, %v401_v60 }
  0xd6   :  { %v230_v42 = vadd.f32 %v229_v62, %v2111_v55 }
  0xd7   :  { %v1365_v43 = vmul.f32 -1.442695, %v423_v33 }
  0xd8   :  { %v444_v33 = vadd.f32 %v443_v35, %v230_v42  ;;  %v2560_v35 = vld [vmem:[#allocation15_spill] sm:$0xff]  ;;  %v2561_v42 = vld [vmem:[#allocation21_spill] sm:$0xff] }
  0xd9   :  { %1395 = vpow2.f32 %v1365_v43 }
  0xdf   :  { %v1396_v4 = vpop.eup %1395 }
  0xe0   :  { %v427_v12 = vadd.f32 1.0, %v1396_v4  ;;  %v2559_v4 = vld [vmem:[#allocation18_spill] sm:$0xff] }
  0xe2   :  { %1397 = vrcp.f32 %v427_v12  ;;  %v439_v46 = vand.u32 2147483648, %v427_v12  ;;  %v437_v29 = vand.u32 2147483647, %v427_v12  ;;  %vm433_vm6 = vweird.f32 %v427_v12 }
  0xe3   :  { %1399 = vtanh.f32 %v444_v33  ;;  %v191_v33 = vpop.f32.mrf.mxu1 }
  0xe4   :  { %v440_v41 = vor.u32 1.1754944e-38, %v439_v46  ;;  %vm438_vm8 = vcmp.eq.f32.partialorder %v437_v29, 8.507059e+37 }
  0xe8   :  { %v1398_v38 = vpop.eup %1397 }
  0xe9   :  { %v429_v63 = vmul.f32 %v1398_v38, %v427_v12  ;;  %vm434_vm5 = vweird.f32 %v1398_v38  ;;  %v1400_v44 = vpop.eup %1399  ;;  %v2558_v12 = vld [vmem:[#allocation20_spill] sm:$0xff] }
  0xea   :  { %vm435_vm7 = vmor %vm433_vm6, %vm434_vm5  ;;  %v446_v2 = vsub.f32 %v1811_v34, %v1400_v44  ;;  %v2556_v34 = vld [vmem:[#allocation17_spill] sm:$0xff] }
  0xeb   :  { %v430_v43 = vsub.f32 1.0, %v429_v63  ;;  %v2557_v63 = vld [vmem:[#allocation14_spill] sm:$0xff] }
  0xed   :  { %v431_v61 = vmul.f32 %v1398_v38, %v430_v43  ;;  %v2168_v43 = vpop.f32.mrf.mxu1 }
  0xee   :  { %2562 = vst [vmem:[#allocation32_spill] sm:$0xff] %v2168_v43 }
  0xef   :  { %v432_v0 = vadd.f32 %v1398_v38, %v431_v61 }
  0xf1   :  { %v436_v50 = vsel %vm435_vm7, %v1398_v38, %v432_v0  ;;  %v232_v38 = vpop.f32.mrf.mxu2 }
  0xf2   :  { %v441_v60 = vsel %vm438_vm8, %v440_v41, %v436_v50 }
  0xf3   :  { %v447_v21 = vmul.f32 %v446_v2, %v441_v60 }
  0xf5   :  { %v2115_v62 = vadd.f32 %v1400_v44, %v447_v21  ;;  %v2172_v61 = vpop.f32.mrf.mxu1 }
  0xf6   :  { %2564 = vst [vmem:[#allocation34_spill] sm:$0xff] %v2172_v61  ;;  %v2574_v61 = vld [vmem:[#allocation25_spill] sm:$0xff] }
  0xf7   :  { %471 = vmatmul.f32.vlgmr.msrb.gmra.mxu1 %v2115_v62  ;;  %491 = vmatmul.f32.vlgmr.msrb.gmra.mxu2 %v2115_v62 }
  0xf8   :  { %511 = vmatmul.f32.vlgmr.msra.gmra.mxu3 %v2115_v62  ;;  %719 = vmatpush.msrb.mxu1 %v1717_v7 }
  0xf9   :  { %791 = vmatpush.msrb.mxu2 %v1696_v1  ;;  %811 = vmatpush.msra.mxu3 %v1820_v37  ;;  %v2170_v46 = vpop.f32.mrf.mxu2 }
  0xfa   :  { %720 = vmatpush.msrb.mxu1 %v1722_v9  ;;  %2563 = vst [vmem:[#allocation33_spill] sm:$0xff] %v2170_v46 }
  0xfb   :  { %792 = vmatpush.msrb.mxu2 %v1702_v3  ;;  %812 = vmatpush.msra.mxu3 %v1830_v40 }
  0xfc   :  { %721 = vmatpush.msrb.mxu1 %v1725_v10 }
  0xfd   :  { %793 = vmatpush.msrb.mxu2 %v1709_v5  ;;  %813 = vmatpush.msra.mxu3 %v1847_v45  ;;  %v2176_v44 = vpop.f32.mrf.mxu1 }
  0xfe   :  { %722 = vmatpush.msrb.mxu1 %v1739_v14  ;;  %2566 = vst [vmem:[#allocation36_spill] sm:$0xff] %v2176_v44 }
  0xff   :  { %794 = vmatpush.msrb.mxu2 %v1714_v6  ;;  %814 = vmatpush.msra.mxu3 %v1857_v47 }
 0x100   :  { %723 = vmatpush.msrb.mxu1 %v1746_v16 }
 0x101   :  { %795 = vmatpush.msrb.mxu2 %v1719_v8  ;;  %815 = vmatpush.msra.mxu3 %v1861_v48  ;;  %v2174_v29 = vpop.f32.mrf.mxu2 }
 0x102   :  { %724 = vmatpush.msrb.mxu1 %v1752_v18  ;;  %2565 = vst [vmem:[#allocation35_spill] sm:$0xff] %v2174_v29  ;;  %v2575_v29 = vld [vmem:[#allocation22_spill] sm:$0xff] }
 0x103   :  { %796 = vmatpush.msrb.mxu2 %v1727_v11  ;;  %816 = vmatpush.msra.mxu3 %v1868_v49 }
 0x104   :  { %725 = vmatpush.msrb.mxu1 %v1758_v20 }
 0x105   :  { %797 = vmatpush.msrb.mxu2 %v1736_v13  ;;  %817 = vmatpush.msra.mxu3 %v1879_v51  ;;  %v2180_v41 = vpop.f32.mrf.mxu1 }
 0x106   :  { %726 = vmatpush.msrb.mxu1 %v1771_v23  ;;  %2568 = vst [vmem:[#allocation38_spill] sm:$0xff] %v2180_v41  ;;  %v2577_v41 = vld [vmem:[#allocation31_spill] sm:$0xff] }
 0x107   :  { %798 = vmatpush.msrb.mxu2 %v1744_v15  ;;  %818 = vmatpush.msra.mxu3 %v1888_v52 }
 0x108   :  { %727 = vmatpush.msrb.mxu1 %v1779_v25 }
 0x109   :  { %799 = vmatpush.msrb.mxu2 %v1750_v17  ;;  %819 = vmatpush.msra.mxu3 %v1893_v53  ;;  %v2178_v0 = vpop.f32.mrf.mxu2 }
 0x10a   :  { %728 = vmatpush.msrb.mxu1 %v1785_v27  ;;  %2567 = vst [vmem:[#allocation37_spill] sm:$0xff] %v2178_v0  ;;  %v2576_v0 = vld [vmem:[#allocation30_spill] sm:$0xff] }
 0x10b   :  { %800 = vmatpush.msrb.mxu2 %v1756_v19  ;;  %820 = vmatpush.msra.mxu3 %v1900_v54 }
 0x10c   :  { %729 = vmatpush.msrb.mxu1 %v1796_v30 }
 0x10d   :  { %801 = vmatpush.msrb.mxu2 %v1767_v22  ;;  %821 = vmatpush.msra.mxu3 %v1911_v56  ;;  %v2184_v50 = vpop.f32.mrf.mxu1 }
 0x10e   :  { %730 = vmatpush.msrb.mxu1 %v1802_v32  ;;  %2570 = vst [vmem:[#allocation40_spill] sm:$0xff] %v2184_v50 }
 0x10f   :  { %802 = vmatpush.msrb.mxu2 %v1775_v24  ;;  %822 = vmatpush.msra.mxu3 %v1920_v57 }
 0x110   :  { %731 = vmatpush.msrb.mxu1 %v1818_v36 }
 0x111   :  { %803 = vmatpush.msrb.mxu2 %v1781_v26  ;;  %823 = vmatpush.msra.mxu3 %v1925_v58  ;;  %v2182_v2 = vpop.f32.mrf.mxu2 }
 0x112   :  { %732 = vmatpush.msrb.mxu1 %v1827_v39  ;;  %2569 = vst [vmem:[#allocation39_spill] sm:$0xff] %v2182_v2 }
 0x113   :  { %804 = vmatpush.msrb.mxu2 %v1787_v28  ;;  %824 = vmatpush.msra.mxu3 %v1932_v59 }
 0x114   :  { %733 = vmatpush.msrb.mxu1 %v2556_v34 }
 0x115   :  { %805 = vmatpush.msrb.mxu2 %v2557_v63  ;;  %825 = vmatpush.msra.mxu3 %v2558_v12  ;;  %v2188_v21 = vpop.f32.mrf.mxu1  ;;  %v192_v12 = vadd.f32 %v191_v33, %v2576_v0 }
 0x116   :  { %734 = vmatpush.msrb.mxu1 %v2559_v4  ;;  %2572 = vst [vmem:[#allocation42_spill] sm:$0xff] %v2188_v21 }
 0x117   :  { %806 = vmatpush.msrb.mxu2 %v2560_v35  ;;  %826 = vmatpush.msra.mxu3 %v2561_v42 }
 0x119   :  { %v2186_v60 = vpop.f32.mrf.mxu2 }
 0x11a   :  { %2571 = vst [vmem:[#allocation41_spill] sm:$0xff] %v2186_v60 }
 0x121   :  { %v2190_v43 = vpop.f32.mrf.mxu2 }
 0x122   :  { %2573 = vst [vmem:[#allocation43_spill] sm:$0xff] %v2190_v43 }
 0x174   :  { %v472_v46 = vpop.f32.mrf.mxu1 }
 0x175   :  { %v473_v42 = vadd.f32 %v472_v46, %v2574_v61 }
 0x177   :  { %v515_v35 = vadd.f32 %v473_v42, %v2575_v29 }
 0x179   :  { %v1366_v44 = vmul.f32 -1.442695, %v515_v35 }
 0x17a   :  { %v492_v4 = vpop.f32.mrf.mxu2 }
 0x17b   :  { %1401 = vpow2.f32 %v1366_v44  ;;  %v493_v2 = vadd.f32 %v492_v4, %v2577_v41  ;;  %v512_v44 = vpop.f32.mrf.mxu3 }
 0x17d   :  { %v535_v63 = vadd.f32 %v493_v2, %v192_v12 }
 0x17f   :  { %v1367_v50 = vmul.f32 -1.442695, %v535_v63 }
 0x181   :  { %v1402_v34 = vpop.eup %1401  ;;  %1403 = vpow2.f32 %v1367_v50 }
 0x182   :  { %v519_v60 = vadd.f32 1.0, %v1402_v34  ;;  %v513_v34 = vadd.f32 %v512_v44, %v2108_v31 }
 0x184   :  { %1405 = vrcp.f32 %v519_v60  ;;  %v531_v42 = vand.u32 2147483648, %v519_v60  ;;  %v529_v29 = vand.u32 2147483647, %v519_v60  ;;  %vm525_vm10 = vweird.f32 %v519_v60 }
 0x186   :  { %v532_v63 = vor.u32 1.1754944e-38, %v531_v42  ;;  %vm530_vm12 = vcmp.eq.f32.partialorder %v529_v29, 8.507059e+37 }
 0x187   :  { %v1404_v21 = vpop.eup %1403 }
 0x188   :  { %v539_v43 = vadd.f32 1.0, %v1404_v21  ;;  %v233_v21 = vadd.f32 %v232_v38, %v2111_v55 }
 0x18a   :  { %v1406_v59 = vpop.eup %1405  ;;  %1407 = vrcp.f32 %v539_v43  ;;  %v551_v39 = vand.u32 2147483648, %v539_v43  ;;  %vm545_vm14 = vweird.f32 %v539_v43 }
 0x18b   :  { %v521_v46 = vmul.f32 %v1406_v59, %v519_v60  ;;  %vm526_vm9 = vweird.f32 %v1406_v59 }
 0x18c   :  { %vm527_vm11 = vmor %vm525_vm10, %vm526_vm9 }
 0x18d   :  { %v522_v61 = vsub.f32 1.0, %v521_v46 }
 0x18f   :  { %v523_v35 = vmul.f32 %v1406_v59, %v522_v61 }
 0x190   :  { %v1408_v33 = vpop.eup %1407 }
 0x191   :  { %v541_v0 = vmul.f32 %v1408_v33, %v539_v43  ;;  %v524_v4 = vadd.f32 %v1406_v59, %v523_v35  ;;  %vm546_vm13 = vweird.f32 %v1408_v33  ;;  %v549_v35 = vand.u32 2147483647, %v539_v43 }
 0x192   :  { %vm547_vm15 = vmor %vm545_vm14, %vm546_vm13 }
 0x193   :  { %v542_v12 = vsub.f32 1.0, %v541_v0  ;;  %v528_v2 = vsel %vm527_vm11, %v1406_v59, %v524_v4  ;;  %v552_v0 = vor.u32 1.1754944e-38, %v551_v39  ;;  %vm550_vm0 = vcmp.eq.f32.partialorder %v549_v35, 8.507059e+37  ;;  %v2592_v35 = vld [vmem:[#allocation33_spill] sm:$0xff] }
 0x194   :  { %v533_v50 = vsel %vm530_vm12, %v532_v63, %v528_v2 }
 0x195   :  { %v555_v46 = vmul.f32 %v533_v50, %v513_v34  ;;  %v543_v41 = vmul.f32 %v1408_v33, %v542_v12 }
 0x197   :  { %v556_v61 = vadd.f32 %v555_v46, %v233_v21  ;;  %v544_v28 = vadd.f32 %v1408_v33, %v543_v41 }
 0x199   :  { %1409 = vtanh.f32 %v556_v61  ;;  %v548_v60 = vsel %vm547_vm15, %v1408_v33, %v544_v28 }
 0x19a   :  { %v553_v29 = vsel %vm550_vm0, %v552_v0, %v548_v60  ;;  %v236_v60 = vadd.f32 %v2592_v35, %v2111_v55 }
 0x19f   :  { %v1410_v42 = vpop.eup %1409 }
 0x1a0   :  { %v558_v59 = vsub.f32 %v2115_v62, %v1410_v42 }
 0x1a2   :  { %v559_v44 = vmul.f32 %v558_v59, %v553_v29 }
 0x1a4   :  { %v2199_v4 = vadd.f32 %v1410_v42, %v559_v44 }
 0x1a6   :  { %583 = vmatmul.f32.vlgmr.msra.gmra.mxu0 %v2199_v4  ;;  %603 = vmatmul.f32.vlgmr.msra.gmra.mxu1 %v2199_v4 }
 0x1a7   :  { %623 = vmatmul.f32.vlgmr.msra.gmra.mxu2 %v2199_v4  ;;  %831 = vmatpush.msra.mxu0 %v1717_v7  ;;  %v2582_v7 = vld [vmem:[#allocation14_spill] sm:$0xff] }
 0x1a8   :  { %903 = vmatpush.msra.mxu1 %v1696_v1  ;;  %923 = vmatpush.msra.mxu2 %v1820_v37  ;;  %v2578_v1 = vld [vmem:[#allocation16_spill] sm:$0xff] }
 0x1a9   :  { %832 = vmatpush.msra.mxu0 %v1722_v9  ;;  %v2584_v9 = vld [vmem:[#allocation18_spill] sm:$0xff] }
 0x1aa   :  { %904 = vmatpush.msra.mxu1 %v1702_v3  ;;  %924 = vmatpush.msra.mxu2 %v1830_v40  ;;  %v2579_v3 = vld [vmem:[#allocation13_spill] sm:$0xff] }
 0x1ab   :  { %833 = vmatpush.msra.mxu0 %v1725_v10  ;;  %v2585_v10 = vld [vmem:[#allocation15_spill] sm:$0xff] }
 0x1ac   :  { %905 = vmatpush.msra.mxu1 %v1709_v5  ;;  %925 = vmatpush.msra.mxu2 %v1847_v45  ;;  %v2580_v5 = vld [vmem:[#allocation19_spill] sm:$0xff] }
 0x1ad   :  { %834 = vmatpush.msra.mxu0 %v1739_v14 }
 0x1ae   :  { %906 = vmatpush.msra.mxu1 %v1714_v6  ;;  %926 = vmatpush.msra.mxu2 %v1857_v47  ;;  %v2581_v6 = vld [vmem:[#allocation17_spill] sm:$0xff] }
 0x1af   :  { %835 = vmatpush.msra.mxu0 %v1746_v16  ;;  %v2588_v16 = vld [vmem:[#allocation32_spill] sm:$0xff] }
 0x1b0   :  { %907 = vmatpush.msra.mxu1 %v1719_v8  ;;  %927 = vmatpush.msra.mxu2 %v1861_v48  ;;  %v2583_v8 = vld [vmem:[#allocation20_spill] sm:$0xff] }
 0x1b1   :  { %836 = vmatpush.msra.mxu0 %v1752_v18  ;;  %v2589_v18 = vld [vmem:[#allocation25_spill] sm:$0xff] }
 0x1b2   :  { %908 = vmatpush.msra.mxu1 %v1727_v11  ;;  %928 = vmatpush.msra.mxu2 %v1868_v49  ;;  %v2586_v11 = vld [vmem:[#allocation21_spill] sm:$0xff] }
 0x1b3   :  { %837 = vmatpush.msra.mxu0 %v1758_v20  ;;  %v2590_v20 = vld [vmem:[#allocation31_spill] sm:$0xff] }
 0x1b4   :  { %909 = vmatpush.msra.mxu1 %v1736_v13  ;;  %929 = vmatpush.msra.mxu2 %v1879_v51 }
 0x1b5   :  { %838 = vmatpush.msra.mxu0 %v1771_v23  ;;  %v2591_v23 = vld [vmem:[#allocation23_spill] sm:$0xff] }
 0x1b6   :  { %910 = vmatpush.msra.mxu1 %v1744_v15  ;;  %930 = vmatpush.msra.mxu2 %v1888_v52  ;;  %v2587_v15 = vld [vmem:[#allocation30_spill] sm:$0xff] }
 0x1b7   :  { %839 = vmatpush.msra.mxu0 %v1779_v25 }
 0x1b8   :  { %911 = vmatpush.msra.mxu1 %v1750_v17  ;;  %931 = vmatpush.msra.mxu2 %v1893_v53  ;;  %v195_v17 = vadd.f32 %v2588_v16, %v2587_v15  ;;  %v2266_v16 = vld [vmem:[#allocation3 + $0x178] sm:$0xff] }
 0x1b9   :  { %840 = vmatpush.msra.mxu0 %v1785_v27 }
 0x1ba   :  { %912 = vmatpush.msra.mxu1 %v1756_v19  ;;  %932 = vmatpush.msra.mxu2 %v1900_v54 }
 0x1bb   :  { %841 = vmatpush.msra.mxu0 %v1796_v30 }
 0x1bc   :  { %913 = vmatpush.msra.mxu1 %v1767_v22  ;;  %933 = vmatpush.msra.mxu2 %v1911_v56 }
 0x1bd   :  { %842 = vmatpush.msra.mxu0 %v1802_v32 }
 0x1be   :  { %914 = vmatpush.msra.mxu1 %v1775_v24  ;;  %934 = vmatpush.msra.mxu2 %v1920_v57 }
 0x1bf   :  { %843 = vmatpush.msra.mxu0 %v1818_v36 }
 0x1c0   :  { %915 = vmatpush.msra.mxu1 %v1781_v26  ;;  %935 = vmatpush.msra.mxu2 %v1925_v58 }
 0x1c1   :  { %844 = vmatpush.msra.mxu0 %v2578_v1 }
 0x1c2   :  { %916 = vmatpush.msra.mxu1 %v2579_v3  ;;  %936 = vmatpush.msra.mxu2 %v2580_v5 }
 0x1c3   :  { %845 = vmatpush.msra.mxu0 %v2581_v6 }
 0x1c4   :  { %917 = vmatpush.msra.mxu1 %v2582_v7  ;;  %937 = vmatpush.msra.mxu2 %v2583_v8 }
 0x1c5   :  { %846 = vmatpush.msra.mxu0 %v2584_v9 }
 0x1c6   :  { %918 = vmatpush.msra.mxu1 %v2585_v10  ;;  %938 = vmatpush.msra.mxu2 %v2586_v11 }
 0x223   :  { %v584_v13 = vpop.f32.mrf.mxu0  ;;  %v604_v14 = vpop.f32.mrf.mxu1 }
 0x224   :  { %v585_v19 = vadd.f32 %v584_v13, %v2589_v18  ;;  %v605_v22 = vadd.f32 %v604_v14, %v2590_v20 }
 0x226   :  { %v627_v24 = vadd.f32 %v585_v19, %v2591_v23  ;;  %v647_v25 = vadd.f32 %v605_v22, %v195_v17  ;;  %v2269_v17 = vld [vmem:[#allocation3 + $0x168] sm:$0xff]  ;;  %v2272_v19 = vld [vmem:[#allocation3 + $0x170] sm:$0xff] }
 0x227   :  { %v2278_v22 = vld [vmem:[#allocation3 + $0x150] sm:$0xff]  ;;  %v2282_v23 = vld [vmem:[#allocation3 + $0x148] sm:$0xff] }
 0x228   :  { %v1368_v26 = vmul.f32 -1.442695, %v627_v24  ;;  %v1369_v27 = vmul.f32 -1.442695, %v647_v25  ;;  %v2285_v24 = vld [vmem:[#allocation3 + $0x138] sm:$0xff]  ;;  %v2289_v25 = vld [vmem:[#allocation3 + $0x130] sm:$0xff] }
 0x22a   :  { %1411 = vpow2.f32 %v1368_v26  ;;  %v624_v12 = vpop.f32.mrf.mxu2  ;;  %v2292_v26 = vld [vmem:[#allocation3 + $0x120] sm:$0xff] }
 0x22b   :  { %1413 = vpow2.f32 %v1369_v27  ;;  %v625_v21 = vadd.f32 %v624_v12, %v2108_v31  ;;  %v2299_v27 = vld [vmem:[#allocation3 + $0x108] sm:$0xff] }
 0x230   :  { %v1412_v28 = vpop.eup %1411 }
 0x231   :  { %v1414_v30 = vpop.eup %1413  ;;  %v631_v32 = vadd.f32 1.0, %v1412_v28  ;;  %v2306_v28 = vld [vmem:[#allocation3 + $0xf0] sm:$0xff] }
 0x232   :  { %v651_v36 = vadd.f32 1.0, %v1414_v30  ;;  %v2313_v30 = vld [vmem:[#allocation3 + $0xd8] sm:$0xff] }
 0x233   :  { %1415 = vrcp.f32 %v631_v32  ;;  %v643_v41 = vand.u32 2147483648, %v631_v32  ;;  %v641_v63 = vand.u32 2147483647, %v631_v32  ;;  %vm637_vm2 = vweird.f32 %v631_v32 }
 0x234   :  { %1417 = vrcp.f32 %v651_v36  ;;  %v663_v44 = vand.u32 2147483648, %v651_v36  ;;  %vm657_vm6 = vweird.f32 %v651_v36  ;;  %v661_v1 = vand.u32 2147483647, %v651_v36 }
 0x235   :  { %v644_v50 = vor.u32 1.1754944e-38, %v643_v41  ;;  %vm642_vm4 = vcmp.eq.f32.partialorder %v641_v63, 8.507059e+37  ;;  %v2369_v41 = vld [vmem:[#allocation3 + $0x18] sm:$0xff]  ;;  %v2593_v63 = vld [vmem:[#allocation34_spill] sm:$0xff] }
 0x236   :  { %v664_v7 = vor.u32 1.1754944e-38, %v663_v44  ;;  %vm662_vm8 = vcmp.eq.f32.partialorder %v661_v1, 8.507059e+37  ;;  %v198_v12 = vadd.f32 %v2593_v63, %v2587_v15 }
 0x239   :  { %v1416_v37 = vpop.eup %1415 }
 0x23a   :  { %v1418_v39 = vpop.eup %1417  ;;  %v633_v62 = vmul.f32 %v1416_v37, %v631_v32  ;;  %vm638_vm1 = vweird.f32 %v1416_v37  ;;  %v2320_v32 = vld [vmem:[#allocation3 + $0xc0] sm:$0xff] }
 0x23b   :  { %v653_v43 = vmul.f32 %v1418_v39, %v651_v36  ;;  %vm639_vm3 = vmor %vm637_vm2, %vm638_vm1  ;;  %vm658_vm5 = vweird.f32 %v1418_v39  ;;  %v2327_v36 = vld [vmem:[#allocation3 + $0xa8] sm:$0xff] }
 0x23c   :  { %v634_v38 = vsub.f32 1.0, %v633_v62  ;;  %vm659_vm7 = vmor %vm657_vm6, %vm658_vm5  ;;  %v2348_v62 = vld [vmem:[#allocation3 + $0x60] sm:$0xff] }
 0x23d   :  { %v654_v2 = vsub.f32 1.0, %v653_v43  ;;  %v2362_v43 = vld [vmem:[#allocation3 + $0x30] sm:$0xff] }
 0x23e   :  { %v635_v33 = vmul.f32 %v1416_v37, %v634_v38  ;;  %v2355_v38 = vld [vmem:[#allocation3 + $0x48] sm:$0xff] }
 0x23f   :  { %v655_v0 = vmul.f32 %v1418_v39, %v654_v2 }
 0x240   :  { %v636_v34 = vadd.f32 %v1416_v37, %v635_v33  ;;  %v2376_v33 = vld [vmem:[#allocation3] sm:$0xff] }
 0x241   :  { %v656_v29 = vadd.f32 %v1418_v39, %v655_v0 }
 0x242   :  { %v640_v46 = vsel %vm639_vm3, %v1416_v37, %v636_v34  ;;  %v2334_v37 = vld [vmem:[#allocation3 + $0x90] sm:$0xff] }
 0x243   :  { %v645_v61 = vsel %vm642_vm4, %v644_v50, %v640_v46  ;;  %v660_v3 = vsel %vm659_vm7, %v1418_v39, %v656_v29  ;;  %v2341_v39 = vld [vmem:[#allocation3 + $0x78] sm:$0xff]  ;;  %v2594_v46 = vld [vmem:[#allocation24_spill] sm:$0xff] }
 0x244   :  { %v667_v42 = vmul.f32 %v645_v61, %v625_v21  ;;  %v665_v10 = vsel %vm662_vm8, %v664_v7, %v660_v3 }
 0x246   :  { %v668_v59 = vadd.f32 %v667_v42, %v236_v60 }
 0x248   :  { %1419 = vtanh.f32 %v668_v59 }
 0x24e   :  { %v1420_v6 = vpop.eup %1419 }
 0x24f   :  { %v670_v9 = vsub.f32 %v2199_v4, %v1420_v6  ;;  %v2275_v4 = vld [vmem:[#allocation3 + $0x160] sm:$0xff] }
 0x251   :  { %v671_v13 = vmul.f32 %v670_v9, %v665_v10 }
 0x253   :  { %v2261_v14 = vadd.f32 %v1420_v6, %v671_v13 }
 0x255   :  { %695 = vmatmul.f32.vlgmr.msrb.gmra.mxu3 %v2261_v14  ;;  %715 = vmatmul.f32.vlgmr.msrb.gmra.mxu0 %v2261_v14 }
 0x256   :  { %735 = vmatmul.f32.vlgmr.msrb.gmra.mxu1 %v2261_v14  ;;  %943 = vmatpush.msrb.mxu3 %v2266_v16 }
 0x257   :  { %1015 = vmatpush.msrb.mxu0 %v2269_v17  ;;  %1035 = vmatpush.msrb.mxu1 %v2272_v19 }
 0x258   :  { %944 = vmatpush.msrb.mxu3 %v2275_v4 }
 0x259   :  { %1016 = vmatpush.msrb.mxu0 %v2278_v22  ;;  %1036 = vmatpush.msrb.mxu1 %v1830_v40  ;;  %v2296_v40 = vld [vmem:[#allocation3 + $0x118] sm:$0xff] }
 0x25a   :  { %945 = vmatpush.msrb.mxu3 %v2282_v23 }
 0x25b   :  { %1017 = vmatpush.msrb.mxu0 %v2285_v24  ;;  %1037 = vmatpush.msrb.mxu1 %v1847_v45  ;;  %v2303_v45 = vld [vmem:[#allocation3 + $0x100] sm:$0xff] }
 0x25c   :  { %946 = vmatpush.msrb.mxu3 %v2289_v25 }
 0x25d   :  { %1018 = vmatpush.msrb.mxu0 %v2292_v26  ;;  %1038 = vmatpush.msrb.mxu1 %v1857_v47  ;;  %v2310_v47 = vld [vmem:[#allocation3 + $0xe8] sm:$0xff] }
 0x25e   :  { %947 = vmatpush.msrb.mxu3 %v2296_v40 }
 0x25f   :  { %1019 = vmatpush.msrb.mxu0 %v2299_v27  ;;  %1039 = vmatpush.msrb.mxu1 %v1861_v48  ;;  %v2317_v48 = vld [vmem:[#allocation3 + $0xd0] sm:$0xff] }
 0x260   :  { %948 = vmatpush.msrb.mxu3 %v2303_v45 }
 0x261   :  { %1020 = vmatpush.msrb.mxu0 %v2306_v28  ;;  %1040 = vmatpush.msrb.mxu1 %v1868_v49  ;;  %v2324_v49 = vld [vmem:[#allocation3 + $0xb8] sm:$0xff] }
 0x262   :  { %949 = vmatpush.msrb.mxu3 %v2310_v47 }
 0x263   :  { %1021 = vmatpush.msrb.mxu0 %v2313_v30  ;;  %1041 = vmatpush.msrb.mxu1 %v1879_v51  ;;  %v2331_v51 = vld [vmem:[#allocation3 + $0xa0] sm:$0xff] }
 0x264   :  { %950 = vmatpush.msrb.mxu3 %v2317_v48 }
 0x265   :  { %1022 = vmatpush.msrb.mxu0 %v2320_v32  ;;  %1042 = vmatpush.msrb.mxu1 %v1888_v52  ;;  %v2338_v52 = vld [vmem:[#allocation3 + $0x88] sm:$0xff] }
 0x266   :  { %951 = vmatpush.msrb.mxu3 %v2324_v49 }
 0x267   :  { %1023 = vmatpush.msrb.mxu0 %v2327_v36  ;;  %1043 = vmatpush.msrb.mxu1 %v1893_v53  ;;  %v2345_v53 = vld [vmem:[#allocation3 + $0x70] sm:$0xff] }
 0x268   :  { %952 = vmatpush.msrb.mxu3 %v2331_v51 }
 0x269   :  { %1024 = vmatpush.msrb.mxu0 %v2334_v37  ;;  %1044 = vmatpush.msrb.mxu1 %v1900_v54  ;;  %v2352_v54 = vld [vmem:[#allocation3 + $0x58] sm:$0xff] }
 0x26a   :  { %953 = vmatpush.msrb.mxu3 %v2338_v52 }
 0x26b   :  { %1025 = vmatpush.msrb.mxu0 %v2341_v39  ;;  %1045 = vmatpush.msrb.mxu1 %v1911_v56  ;;  %v2359_v56 = vld [vmem:[#allocation3 + $0x40] sm:$0xff] }
 0x26c   :  { %954 = vmatpush.msrb.mxu3 %v2345_v53 }
 0x26d   :  { %1026 = vmatpush.msrb.mxu0 %v2348_v62  ;;  %1046 = vmatpush.msrb.mxu1 %v1920_v57  ;;  %v2366_v57 = vld [vmem:[#allocation3 + $0x28] sm:$0xff] }
 0x26e   :  { %955 = vmatpush.msrb.mxu3 %v2352_v54 }
 0x26f   :  { %1027 = vmatpush.msrb.mxu0 %v2355_v38  ;;  %1047 = vmatpush.msrb.mxu1 %v1925_v58  ;;  %v2373_v58 = vld [vmem:[#allocation3 + $0x10] sm:$0xff] }
 0x270   :  { %956 = vmatpush.msrb.mxu3 %v2359_v56 }
 0x271   :  { %1028 = vmatpush.msrb.mxu0 %v2362_v43  ;;  %1048 = vmatpush.msrb.mxu1 %v2580_v5 }
 0x272   :  { %957 = vmatpush.msrb.mxu3 %v2366_v57 }
 0x273   :  { %1029 = vmatpush.msrb.mxu0 %v2369_v41  ;;  %1049 = vmatpush.msrb.mxu1 %v2583_v8 }
 0x274   :  { %958 = vmatpush.msrb.mxu3 %v2373_v58 }
 0x275   :  { %1030 = vmatpush.msrb.mxu0 %v2376_v33  ;;  %1050 = vmatpush.msrb.mxu1 %v2586_v11 }
 0x2d2   :  { %v716_v5 = vpop.f32.mrf.mxu0 }
 0x2d3   :  { %v717_v34 = vadd.f32 %v716_v5, %v2590_v20  ;;  %v736_v10 = vpop.f32.mrf.mxu1 }
 0x2d5   :  { %v759_v2 = vadd.f32 %v717_v34, %v198_v12  ;;  %v737_v12 = vadd.f32 %v736_v10, %v2108_v31 }
 0x2d7   :  { %v1371_v50 = vmul.f32 -1.442695, %v759_v2 }
 0x2d8   :  { %v696_v21 = vpop.f32.mrf.mxu3 }
 0x2d9   :  { %v697_v8 = vadd.f32 %v696_v21, %v2589_v18  ;;  %1421 = vpow2.f32 %v1371_v50  ;;  %v2595_v50 = vld [vmem:[#allocation35_spill] sm:$0xff] }
 0x2da   :  { %v239_v21 = vadd.f32 %v2595_v50, %v2111_v55 }
 0x2db   :  { %v739_v61 = vadd.f32 %v697_v8, %v2594_v46 }
 0x2dd   :  { %v1370_v35 = vmul.f32 -1.442695, %v739_v61 }
 0x2df   :  { %1423 = vpow2.f32 %v1370_v35  ;;  %v1422_v60 = vpop.eup %1421 }
 0x2e0   :  { %v763_v0 = vadd.f32 1.0, %v1422_v60 }
 0x2e2   :  { %v775_v60 = vand.u32 2147483648, %v763_v0  ;;  %vm769_vm14 = vweird.f32 %v763_v0 }
 0x2e5   :  { %v1424_v42 = vpop.eup %1423 }
 0x2e6   :  { %v743_v11 = vadd.f32 1.0, %v1424_v42  ;;  %v773_v42 = vand.u32 2147483647, %v763_v0 }
 0x2e8   :  { %1425 = vrcp.f32 %v743_v11  ;;  %v755_v6 = vand.u32 2147483648, %v743_v11  ;;  %v753_v9 = vand.u32 2147483647, %v743_v11  ;;  %vm749_vm10 = vweird.f32 %v743_v11 }
 0x2e9   :  { %1427 = vrcp.f32 %v763_v0  ;;  %vm774_vm0 = vcmp.eq.f32.partialorder %v773_v42, 8.507059e+37 }
 0x2ea   :  { %v756_v63 = vor.u32 1.1754944e-38, %v755_v6  ;;  %vm754_vm12 = vcmp.eq.f32.partialorder %v753_v9, 8.507059e+37  ;;  %v2596_v9 = vld [vmem:[#allocation36_spill] sm:$0xff] }
 0x2eb   :  { %v201_v10 = vadd.f32 %v2596_v9, %v2587_v15 }
 0x2ee   :  { %v1426_v59 = vpop.eup %1425 }
 0x2ef   :  { %v1428_v29 = vpop.eup %1427  ;;  %v745_v44 = vmul.f32 %v1426_v59, %v743_v11  ;;  %vm750_vm9 = vweird.f32 %v1426_v59 }
 0x2f0   :  { %v765_v3 = vmul.f32 %v1428_v29, %v763_v0  ;;  %vm751_vm11 = vmor %vm749_vm10, %vm750_vm9  ;;  %vm770_vm13 = vweird.f32 %v1428_v29  ;;  %v1505_v0 = vld [vmem:[#allocation3 + $0x140] sm:$0xff] }
 0x2f1   :  { %v746_v1 = vsub.f32 1.0, %v745_v44  ;;  %vm771_vm15 = vmor %vm769_vm14, %vm770_vm13 }
 0x2f2   :  { %v766_v5 = vsub.f32 1.0, %v765_v3 }
 0x2f3   :  { %v747_v7 = vmul.f32 %v1426_v59, %v746_v1  ;;  %v776_v1 = vor.u32 1.1754944e-38, %v775_v60 }
 0x2f4   :  { %v767_v46 = vmul.f32 %v1428_v29, %v766_v5  ;;  %v2597_v5 = vld [vmem:[#allocation26_spill] sm:$0xff] }
 0x2f5   :  { %v748_v13 = vadd.f32 %v1426_v59, %v747_v7 }
 0x2f6   :  { %v768_v35 = vadd.f32 %v1428_v29, %v767_v46 }
 0x2f7   :  { %v752_v34 = vsel %vm751_vm11, %v1426_v59, %v748_v13 }
 0x2f8   :  { %v757_v2 = vsel %vm754_vm12, %v756_v63, %v752_v34  ;;  %v772_v11 = vsel %vm771_vm15, %v1428_v29, %v768_v35  ;;  %v1506_v29 = vld [vmem:[#allocation3 + $0x128] sm:$0xff] }
 0x2f9   :  { %v779_v8 = vmul.f32 %v757_v2, %v737_v12  ;;  %v777_v3 = vsel %vm774_vm0, %v776_v1, %v772_v11 }
 0x2fb   :  { %v780_v61 = vadd.f32 %v779_v8, %v239_v21 }
 0x2fd   :  { %1429 = vtanh.f32 %v780_v61 }
 0x303   :  { %v1430_v44 = vpop.eup %1429 }
 0x304   :  { %v782_v59 = vsub.f32 %v2261_v14, %v1430_v44  ;;  %v1504_v14 = vld [vmem:[#allocation3 + $0x158] sm:$0xff] }
 0x306   :  { %v783_v6 = vmul.f32 %v782_v59, %v777_v3 }
 0x308   :  { %v2389_v7 = vadd.f32 %v1430_v44, %v783_v6 }
 0x30a   :  { %807 = vmatmul.f32.vlgmr.msrb.gmra.mxu2 %v2389_v7  ;;  %827 = vmatmul.f32.vlgmr.msra.gmra.mxu3 %v2389_v7 }
 0x30b   :  { %847 = vmatmul.f32.vlgmr.msra.gmra.mxu0 %v2389_v7  ;;  %1055 = vmatpush.msrb.mxu2 %v2266_v16 }
 0x30c   :  { %1127 = vmatpush.msra.mxu3 %v2269_v17  ;;  %1147 = vmatpush.msra.mxu0 %v2272_v19  ;;  %v1507_v17 = vld [vmem:[#allocation3 + $0x110] sm:$0xff]  ;;  %v1508_v19 = vld [vmem:[#allocation3 + $0xf8] sm:$0xff] }
 0x30d   :  { %1056 = vmatpush.msrb.mxu2 %v2275_v4 }
 0x30e   :  { %1128 = vmatpush.msra.mxu3 %v2278_v22  ;;  %1148 = vmatpush.msra.mxu0 %v1504_v14  ;;  %v1509_v22 = vld [vmem:[#allocation3 + $0xe0] sm:$0xff] }
 0x30f   :  { %1057 = vmatpush.msrb.mxu2 %v2282_v23 }
 0x310   :  { %1129 = vmatpush.msra.mxu3 %v2285_v24  ;;  %1149 = vmatpush.msra.mxu0 %v1505_v0  ;;  %v1510_v24 = vld [vmem:[#allocation3 + $0xc8] sm:$0xff] }
 0x311   :  { %1058 = vmatpush.msrb.mxu2 %v2289_v25 }
 0x312   :  { %1130 = vmatpush.msra.mxu3 %v2292_v26  ;;  %1150 = vmatpush.msra.mxu0 %v1506_v29  ;;  %v1511_v26 = vld [vmem:[#allocation3 + $0xb0] sm:$0xff] }
 0x313   :  { %1059 = vmatpush.msrb.mxu2 %v2296_v40 }
 0x314   :  { %1131 = vmatpush.msra.mxu3 %v2299_v27  ;;  %1151 = vmatpush.msra.mxu0 %v1507_v17  ;;  %v1512_v27 = vld [vmem:[#allocation3 + $0x98] sm:$0xff]  ;;  %v2598_v17 = vld [vmem:[#allocation37_spill] sm:$0xff] }
 0x315   :  { %1060 = vmatpush.msrb.mxu2 %v2303_v45 }
 0x316   :  { %1132 = vmatpush.msra.mxu3 %v2306_v28  ;;  %1152 = vmatpush.msra.mxu0 %v1508_v19  ;;  %v1513_v28 = vld [vmem:[#allocation3 + $0x80] sm:$0xff]  ;;  %v242_v19 = vadd.f32 %v2598_v17, %v2111_v55 }
 0x317   :  { %1061 = vmatpush.msrb.mxu2 %v2310_v47 }
 0x318   :  { %1133 = vmatpush.msra.mxu3 %v2313_v30  ;;  %1153 = vmatpush.msra.mxu0 %v1509_v22  ;;  %v1514_v30 = vld [vmem:[#allocation3 + $0x68] sm:$0xff] }
 0x319   :  { %1062 = vmatpush.msrb.mxu2 %v2317_v48 }
 0x31a   :  { %1134 = vmatpush.msra.mxu3 %v2320_v32  ;;  %1154 = vmatpush.msra.mxu0 %v1510_v24  ;;  %v1515_v32 = vld [vmem:[#allocation3 + $0x50] sm:$0xff] }
 0x31b   :  { %1063 = vmatpush.msrb.mxu2 %v2324_v49 }
 0x31c   :  { %1135 = vmatpush.msra.mxu3 %v2327_v36  ;;  %1155 = vmatpush.msra.mxu0 %v1511_v26  ;;  %v1516_v36 = vld [vmem:[#allocation3 + $0x38] sm:$0xff] }
 0x31d   :  { %1064 = vmatpush.msrb.mxu2 %v2331_v51 }
 0x31e   :  { %1136 = vmatpush.msra.mxu3 %v2334_v37  ;;  %1156 = vmatpush.msra.mxu0 %v1512_v27  ;;  %v1517_v37 = vld [vmem:[#allocation3 + $0x20] sm:$0xff] }
 0x31f   :  { %1065 = vmatpush.msrb.mxu2 %v2338_v52 }
 0x320   :  { %1137 = vmatpush.msra.mxu3 %v2341_v39  ;;  %1157 = vmatpush.msra.mxu0 %v1513_v28  ;;  %v1518_v39 = vld [vmem:[#allocation3 + $0x8] sm:$0xff] }
 0x321   :  { %1066 = vmatpush.msrb.mxu2 %v2345_v53 }
 0x322   :  { %1138 = vmatpush.msra.mxu3 %v2348_v62  ;;  %1158 = vmatpush.msra.mxu0 %v1514_v30 }
 0x323   :  { %1067 = vmatpush.msrb.mxu2 %v2352_v54 }
 0x324   :  { %1139 = vmatpush.msra.mxu3 %v2355_v38  ;;  %1159 = vmatpush.msra.mxu0 %v1515_v32 }
 0x325   :  { %1068 = vmatpush.msrb.mxu2 %v2359_v56 }
 0x326   :  { %1140 = vmatpush.msra.mxu3 %v2362_v43  ;;  %1160 = vmatpush.msra.mxu0 %v1516_v36 }
 0x327   :  { %1069 = vmatpush.msrb.mxu2 %v2366_v57 }
 0x328   :  { %1141 = vmatpush.msra.mxu3 %v2369_v41  ;;  %1161 = vmatpush.msra.mxu0 %v1517_v37 }
 0x329   :  { %1070 = vmatpush.msrb.mxu2 %v2373_v58 }
 0x32a   :  { %1142 = vmatpush.msra.mxu3 %v2376_v33  ;;  %1162 = vmatpush.msra.mxu0 %v1518_v39 }
 0x388   :  { %v848_v1 = vpop.f32.mrf.mxu0 }
 0x389   :  { %v849_v14 = vadd.f32 %v848_v1, %v2108_v31 }
 0x38d   :  { %v808_v62 = vpop.f32.mrf.mxu2  ;;  %v828_v38 = vpop.f32.mrf.mxu3 }
 0x38e   :  { %v809_v43 = vadd.f32 %v808_v62, %v2589_v18  ;;  %v829_v13 = vadd.f32 %v828_v38, %v2590_v20 }
 0x390   :  { %v851_v63 = vadd.f32 %v809_v43, %v2597_v5  ;;  %v871_v41 = vadd.f32 %v829_v13, %v201_v10 }
 0x392   :  { %v1372_v12 = vmul.f32 -1.442695, %v851_v63  ;;  %v1373_v34 = vmul.f32 -1.442695, %v871_v41 }
 0x394   :  { %1431 = vpow2.f32 %v1372_v12 }
 0x395   :  { %1433 = vpow2.f32 %v1373_v34 }
 0x39a   :  { %v1432_v2 = vpop.eup %1431 }
 0x39b   :  { %v1434_v33 = vpop.eup %1433  ;;  %v855_v50 = vadd.f32 1.0, %v1432_v2 }
 0x39c   :  { %v875_v21 = vadd.f32 1.0, %v1434_v33 }
 0x39d   :  { %1435 = vrcp.f32 %v855_v50  ;;  %v867_v60 = vand.u32 2147483648, %v855_v50  ;;  %v865_v44 = vand.u32 2147483647, %v855_v50  ;;  %vm861_vm2 = vweird.f32 %v855_v50 }
 0x39e   :  { %1437 = vrcp.f32 %v875_v21  ;;  %v887_v28 = vand.u32 2147483648, %v875_v21  ;;  %vm881_vm6 = vweird.f32 %v875_v21  ;;  %v885_v30 = vand.u32 2147483647, %v875_v21 }
 0x39f   :  { %v868_v3 = vor.u32 1.1754944e-38, %v867_v60  ;;  %vm866_vm4 = vcmp.eq.f32.partialorder %v865_v44, 8.507059e+37 }
 0x3a0   :  { %v888_v37 = vor.u32 1.1754944e-38, %v887_v28  ;;  %vm886_vm8 = vcmp.eq.f32.partialorder %v885_v30, 8.507059e+37  ;;  %v2603_v30 = vld [vmem:[#allocation28_spill] sm:$0xff] }
 0x3a3   :  { %v1436_v8 = vpop.eup %1435 }
 0x3a4   :  { %v1438_v46 = vpop.eup %1437  ;;  %v857_v61 = vmul.f32 %v1436_v8, %v855_v50  ;;  %vm862_vm1 = vweird.f32 %v1436_v8 }
 0x3a5   :  { %v877_v42 = vmul.f32 %v1438_v46, %v875_v21  ;;  %vm863_vm3 = vmor %vm861_vm2, %vm862_vm1  ;;  %vm882_vm5 = vweird.f32 %v1438_v46 }
 0x3a6   :  { %v858_v35 = vsub.f32 1.0, %v857_v61  ;;  %vm883_vm7 = vmor %vm881_vm6, %vm882_vm5 }
 0x3a7   :  { %v878_v6 = vsub.f32 1.0, %v877_v42 }
 0x3a8   :  { %v859_v11 = vmul.f32 %v1436_v8, %v858_v35 }
 0x3a9   :  { %v879_v24 = vmul.f32 %v1438_v46, %v878_v6 }
 0x3aa   :  { %v860_v59 = vadd.f32 %v1436_v8, %v859_v11 }
 0x3ab   :  { %v880_v27 = vadd.f32 %v1438_v46, %v879_v24  ;;  %v2602_v24 = vld [vmem:[#allocation40_spill] sm:$0xff] }
 0x3ac   :  { %v864_v0 = vsel %vm863_vm3, %v1436_v8, %v860_v59 }
 0x3ad   :  { %v869_v29 = vsel %vm866_vm4, %v868_v3, %v864_v0  ;;  %v884_v32 = vsel %vm883_vm7, %v1438_v46, %v880_v27  ;;  %v2601_v46 = vld [vmem:[#allocation39_spill] sm:$0xff] }
 0x3ae   :  { %v891_v22 = vmul.f32 %v869_v29, %v849_v14  ;;  %v889_v62 = vsel %vm886_vm8, %v888_v37, %v884_v32  ;;  %v245_v61 = vadd.f32 %v2601_v46, %v2111_v55 }
 0x3b0   :  { %v892_v26 = vadd.f32 %v891_v22, %v242_v19 }
 0x3b2   :  { %1439 = vtanh.f32 %v892_v26  ;;  %v207_v26 = vadd.f32 %v2602_v24, %v2587_v15  ;;  %v1240_v24 = vld [vmem:[#allocation6 + $0x38] sm:$0xff] }
 0x3b8   :  { %v1440_v36 = vpop.eup %1439 }
 0x3b9   :  { %v894_v39 = vsub.f32 %v2389_v7, %v1440_v36 }
 0x3bb   :  { %v895_v38 = vmul.f32 %v894_v39, %v889_v62 }
 0x3bd   :  { %v2436_v9 = vadd.f32 %v1440_v36, %v895_v38 }
 0x3bf   :  { %919 = vmatmul.f32.vlgmr.msra.gmra.mxu1 %v2436_v9  ;;  %939 = vmatmul.f32.vlgmr.msra.gmra.mxu2 %v2436_v9 }
 0x3c0   :  { %959 = vmatmul.f32.vlgmr.msrb.gmra.mxu3 %v2436_v9  ;;  %1167 = vmatpush.msra.mxu1 %v2266_v16 }
 0x3c2   :  { %1168 = vmatpush.msra.mxu1 %v2275_v4 }
 0x3c4   :  { %1169 = vmatpush.msra.mxu1 %v2282_v23  ;;  %v2599_v23 = vld [vmem:[#allocation27_spill] sm:$0xff] }
 0x3c6   :  { %1170 = vmatpush.msra.mxu1 %v2289_v25 }
 0x3c8   :  { %1171 = vmatpush.msra.mxu1 %v2296_v40 }
 0x3ca   :  { %1172 = vmatpush.msra.mxu1 %v2303_v45 }
 0x3cc   :  { %1173 = vmatpush.msra.mxu1 %v2310_v47  ;;  %v2600_v47 = vld [vmem:[#allocation38_spill] sm:$0xff] }
 0x3ce   :  { %1174 = vmatpush.msra.mxu1 %v2317_v48  ;;  %v204_v48 = vadd.f32 %v2600_v47, %v2587_v15 }
 0x3d0   :  { %1175 = vmatpush.msra.mxu1 %v2324_v49 }
 0x3d2   :  { %1176 = vmatpush.msra.mxu1 %v2331_v51 }
 0x3d4   :  { %1177 = vmatpush.msra.mxu1 %v2338_v52 }
 0x3d6   :  { %1178 = vmatpush.msra.mxu1 %v2345_v53 }
 0x3d8   :  { %1179 = vmatpush.msra.mxu1 %v2352_v54 }
 0x3da   :  { %1180 = vmatpush.msra.mxu1 %v2359_v56 }
 0x3dc   :  { %1181 = vmatpush.msra.mxu1 %v2366_v57 }
 0x3de   :  { %1182 = vmatpush.msra.mxu1 %v2373_v58 }
 0x43c   :  { %v920_v16 = vpop.f32.mrf.mxu1 }
 0x43d   :  { %v921_v4 = vadd.f32 %v920_v16, %v2589_v18 }
 0x43f   :  { %v963_v25 = vadd.f32 %v921_v4, %v2599_v23 }
 0x441   :  { %v1374_v40 = vmul.f32 -1.442695, %v963_v25 }
 0x442   :  { %v940_v45 = vpop.f32.mrf.mxu2 }
 0x443   :  { %1441 = vpow2.f32 %v1374_v40  ;;  %v941_v49 = vadd.f32 %v940_v45, %v2590_v20  ;;  %v960_v41 = vpop.f32.mrf.mxu3 }
 0x444   :  { %v961_v50 = vadd.f32 %v960_v41, %v2108_v31 }
 0x445   :  { %v983_v51 = vadd.f32 %v941_v49, %v204_v48 }
 0x447   :  { %v1375_v52 = vmul.f32 -1.442695, %v983_v51 }
 0x449   :  { %v1442_v53 = vpop.eup %1441  ;;  %1443 = vpow2.f32 %v1375_v52 }
 0x44a   :  { %v967_v54 = vadd.f32 1.0, %v1442_v53 }
 0x44c   :  { %1445 = vrcp.f32 %v967_v54  ;;  %v979_v43 = vand.u32 2147483648, %v967_v54  ;;  %v977_v5 = vand.u32 2147483647, %v967_v54  ;;  %vm973_vm10 = vweird.f32 %v967_v54 }
 0x44e   :  { %v980_v2 = vor.u32 1.1754944e-38, %v979_v43  ;;  %vm978_vm12 = vcmp.eq.f32.partialorder %v977_v5, 8.507059e+37 }
 0x44f   :  { %v1444_v56 = vpop.eup %1443 }
 0x450   :  { %v987_v57 = vadd.f32 1.0, %v1444_v56 }
 0x452   :  { %v1446_v58 = vpop.eup %1445  ;;  %1447 = vrcp.f32 %v987_v57  ;;  %v999_v44 = vand.u32 2147483648, %v987_v57  ;;  %vm993_vm14 = vweird.f32 %v987_v57  ;;  %v997_v1 = vand.u32 2147483647, %v987_v57 }
 0x453   :  { %v969_v7 = vmul.f32 %v1446_v58, %v967_v54  ;;  %vm974_vm9 = vweird.f32 %v1446_v58 }
 0x454   :  { %vm975_vm11 = vmor %vm973_vm10, %vm974_vm9  ;;  %v1000_v6 = vor.u32 1.1754944e-38, %v999_v44  ;;  %vm998_vm0 = vcmp.eq.f32.partialorder %v997_v1, 8.507059e+37  ;;  %v2605_v44 = vld [vmem:[#allocation42_spill] sm:$0xff] }
 0x455   :  { %v970_v10 = vsub.f32 1.0, %v969_v7  ;;  %v2604_v7 = vld [vmem:[#allocation41_spill] sm:$0xff]  ;;  %v210_v1 = vadd.f32 %v2605_v44, %v2587_v15 }
 0x457   :  { %v971_v13 = vmul.f32 %v1446_v58, %v970_v10  ;;  %v248_v10 = vadd.f32 %v2604_v7, %v2111_v55 }
 0x458   :  { %v1448_v63 = vpop.eup %1447 }
 0x459   :  { %v989_v12 = vmul.f32 %v1448_v63, %v987_v57  ;;  %v972_v34 = vadd.f32 %v1446_v58, %v971_v13  ;;  %vm994_vm13 = vweird.f32 %v1448_v63 }
 0x45a   :  { %vm995_vm15 = vmor %vm993_vm14, %vm994_vm13 }
 0x45b   :  { %v990_v33 = vsub.f32 1.0, %v989_v12  ;;  %v976_v21 = vsel %vm975_vm11, %v1446_v58, %v972_v34 }
 0x45c   :  { %v981_v8 = vsel %vm978_vm12, %v980_v2, %v976_v21 }
 0x45d   :  { %v1003_v35 = vmul.f32 %v981_v8, %v961_v50  ;;  %v991_v60 = vmul.f32 %v1448_v63, %v990_v33 }
 0x45f   :  { %v1004_v42 = vadd.f32 %v1003_v35, %v245_v61  ;;  %v992_v11 = vadd.f32 %v1448_v63, %v991_v60  ;;  %v1248_v61 = vld [vmem:[#allocation6 + $0x78] sm:$0xff]  ;;  %v1247_v35 = vld [vmem:[#allocation6 + $0x70] sm:$0xff]  ;;  %v1246_v60 = vld [vmem:[#allocation6 + $0x68] sm:$0xff] }
 0x460   :  { %1253 = vmatpush.msra.mxu2 %v1248_v61  ;;  %v1279_v61 = vld [vmem:[#allocation8 + $0x28] sm:$0xff] }
 0x461   :  { %1449 = vtanh.f32 %v1004_v42  ;;  %v996_v59 = vsel %vm995_vm15, %v1448_v63, %v992_v11  ;;  %v1245_v42 = vld [vmem:[#allocation6 + $0x60] sm:$0xff] }
 0x462   :  { %v1001_v0 = vsel %vm998_vm0, %v1000_v6, %v996_v59  ;;  %1254 = vmatpush.msra.mxu2 %v1247_v35 }
 0x464   :  { %1255 = vmatpush.msra.mxu2 %v1246_v60 }
 0x466   :  { %1256 = vmatpush.msra.mxu2 %v1245_v42 }
 0x467   :  { %v1450_v3 = vpop.eup %1449 }
 0x468   :  { %v1006_v14 = vsub.f32 %v2436_v9, %v1450_v3 }
 0x46a   :  { %v1007_v29 = vmul.f32 %v1006_v14, %v1001_v0  ;;  %v1243_v14 = vld [vmem:[#allocation6 + $0x50] sm:$0xff]  ;;  %v1242_v0 = vld [vmem:[#allocation6 + $0x48] sm:$0xff] }
 0x46c   :  { %v1008_v17 = vadd.f32 %v1450_v3, %v1007_v29  ;;  %v1244_v3 = vld [vmem:[#allocation6 + $0x58] sm:$0xff]  ;;  %v1241_v29 = vld [vmem:[#allocation6 + $0x40] sm:$0xff] }
 0x46d   :  { %1257 = vmatpush.msra.mxu2 %v1244_v3 }
 0x46e   :  { %1031 = vmatmul.f32.vlgmr.msrb.gmra.mxu0 %v1008_v17  ;;  %1051 = vmatmul.f32.vlgmr.msrb.gmra.mxu1 %v1008_v17 }
 0x46f   :  { %1071 = vmatmul.f32.vlgmr.msrb.gmra.mxu2 %v1008_v17 }
 0x470   :  { %1258 = vmatpush.msra.mxu2 %v1243_v14 }
 0x472   :  { %1259 = vmatpush.msra.mxu2 %v1242_v0  ;;  %v1276_v0 = vld [vmem:[#allocation8 + $0x10] sm:$0xff] }
 0x474   :  { %1260 = vmatpush.msra.mxu2 %v1241_v29  ;;  %v1275_v29 = vld [vmem:[#allocation8 + $0x8] sm:$0xff] }
 0x476   :  { %1261 = vmatpush.msra.mxu2 %v1240_v24 }
 0x4eb   :  { %v1032_v19 = vpop.f32.mrf.mxu0  ;;  %v1052_v22 = vpop.f32.mrf.mxu1 }
 0x4ec   :  { %v1033_v27 = vadd.f32 %v1032_v19, %v2589_v18  ;;  %v1053_v28 = vadd.f32 %v1052_v22, %v2590_v20 }
 0x4ee   :  { %v1075_v32 = vadd.f32 %v1033_v27, %v2603_v30  ;;  %v1095_v36 = vadd.f32 %v1053_v28, %v207_v26  ;;  %v2606_v26 = vld [vmem:[#allocation29_spill] sm:$0xff]  ;;  %v1239_v28 = vld [vmem:[#allocation6 + $0x30] sm:$0xff]  ;;  %v1237_v30 = vld [vmem:[#allocation6 + $0x20] sm:$0xff] }
 0x4ef   :  { %1262 = vmatpush.msra.mxu2 %v1239_v28 }
 0x4f0   :  { %v1376_v37 = vmul.f32 -1.442695, %v1075_v32  ;;  %v1377_v39 = vmul.f32 -1.442695, %v1095_v36  ;;  %v1236_v32 = vld [vmem:[#allocation6 + $0x18] sm:$0xff] }
 0x4f2   :  { %1451 = vpow2.f32 %v1376_v37  ;;  %v1072_v51 = vpop.f32.mrf.mxu2  ;;  %v1235_v37 = vld [vmem:[#allocation6 + $0x10] sm:$0xff] }
 0x4f3   :  { %1453 = vpow2.f32 %v1377_v39  ;;  %v1073_v56 = vadd.f32 %v1072_v51, %v2108_v31 }
 0x4f8   :  { %v1452_v62 = vpop.eup %1451 }
 0x4f9   :  { %v1454_v38 = vpop.eup %1453  ;;  %v1079_v9 = vadd.f32 1.0, %v1452_v62  ;;  %v1234_v62 = vld [vmem:[#allocation6 + $0x8] sm:$0xff] }
 0x4fa   :  { %v1099_v16 = vadd.f32 1.0, %v1454_v38 }
 0x4fb   :  { %1455 = vrcp.f32 %v1079_v9  ;;  %v1091_v47 = vand.u32 2147483648, %v1079_v9  ;;  %v1089_v49 = vand.u32 2147483647, %v1079_v9  ;;  %vm1085_vm2 = vweird.f32 %v1079_v9 }
 0x4fc   :  { %1457 = vrcp.f32 %v1099_v16  ;;  %v1111_v41 = vand.u32 2147483648, %v1099_v16  ;;  %vm1105_vm6 = vweird.f32 %v1099_v16  ;;  %v1109_v12 = vand.u32 2147483647, %v1099_v16 }
 0x4fd   :  { %v1092_v54 = vor.u32 1.1754944e-38, %v1091_v47  ;;  %vm1090_vm4 = vcmp.eq.f32.partialorder %v1089_v49, 8.507059e+37 }
 0x4fe   :  { %v1112_v33 = vor.u32 1.1754944e-38, %v1111_v41  ;;  %vm1110_vm8 = vcmp.eq.f32.partialorder %v1109_v12, 8.507059e+37  ;;  %v1281_v12 = vld [vmem:[#allocation8 + $0x38] sm:$0xff] }
 0x501   :  { %v1456_v4 = vpop.eup %1455 }
 0x502   :  { %v1458_v23 = vpop.eup %1457  ;;  %v1081_v25 = vmul.f32 %v1456_v4, %v1079_v9  ;;  %vm1086_vm1 = vweird.f32 %v1456_v4  ;;  %v1233_v9 = vld [vmem:[#allocation6] sm:$0xff] }
 0x503   :  { %v1101_v45 = vmul.f32 %v1458_v23, %v1099_v16  ;;  %vm1087_vm3 = vmor %vm1085_vm2, %vm1086_vm1  ;;  %vm1106_vm5 = vweird.f32 %v1458_v23  ;;  %v1289_v16 = vld [vmem:[#allocation8 + $0x78] sm:$0xff] }
 0x504   :  { %v1082_v40 = vsub.f32 1.0, %v1081_v25  ;;  %vm1107_vm7 = vmor %vm1105_vm6, %vm1106_vm5  ;;  %1294 = vmatpush.msrb.mxu3 %v1289_v16 }
 0x505   :  { %v1102_v53 = vsub.f32 1.0, %v1101_v45 }
 0x506   :  { %v1083_v48 = vmul.f32 %v1456_v4, %v1082_v40  ;;  %v1286_v40 = vld [vmem:[#allocation8 + $0x60] sm:$0xff] }
 0x507   :  { %v1103_v13 = vmul.f32 %v1458_v23, %v1102_v53  ;;  %v1284_v53 = vld [vmem:[#allocation8 + $0x50] sm:$0xff] }
 0x508   :  { %v1084_v52 = vadd.f32 %v1456_v4, %v1083_v48  ;;  %v1285_v48 = vld [vmem:[#allocation8 + $0x58] sm:$0xff] }
 0x509   :  { %v1104_v63 = vadd.f32 %v1458_v23, %v1103_v13  ;;  %v1282_v13 = vld [vmem:[#allocation8 + $0x40] sm:$0xff] }
 0x50a   :  { %v1088_v57 = vsel %vm1087_vm3, %v1456_v4, %v1084_v52  ;;  %v1288_v4 = vld [vmem:[#allocation8 + $0x70] sm:$0xff] }
 0x50b   :  { %v1093_v58 = vsel %vm1090_vm4, %v1092_v54, %v1088_v57  ;;  %v1108_v34 = vsel %vm1107_vm7, %v1458_v23, %v1104_v63  ;;  %v1287_v23 = vld [vmem:[#allocation8 + $0x68] sm:$0xff]  ;;  %1295 = vmatpush.msrb.mxu3 %v1288_v4 }
 0x50c   :  { %v1115_v43 = vmul.f32 %v1093_v58, %v1073_v56  ;;  %v1113_v21 = vsel %vm1110_vm8, %v1112_v33, %v1108_v34  ;;  %v1283_v58 = vld [vmem:[#allocation8 + $0x48] sm:$0xff]  ;;  %v2607_v34 = vld [vmem:[#allocation43_spill] sm:$0xff] }
 0x50d   :  { %1296 = vmatpush.msrb.mxu3 %v1287_v23 }
 0x50e   :  { %v1116_v5 = vadd.f32 %v1115_v43, %v248_v10 }
 0x50f   :  { %1297 = vmatpush.msrb.mxu3 %v1286_v40 }
 0x510   :  { %1459 = vtanh.f32 %v1116_v5 }
 0x511   :  { %1298 = vmatpush.msrb.mxu3 %v1285_v48 }
 0x513   :  { %1299 = vmatpush.msrb.mxu3 %v1284_v53 }
 0x515   :  { %1300 = vmatpush.msrb.mxu3 %v1283_v58 }
 0x516   :  { %v1460_v2 = vpop.eup %1459 }
 0x517   :  { %v1118_v50 = vsub.f32 %v1008_v17, %v1460_v2  ;;  %1301 = vmatpush.msrb.mxu3 %v1282_v13 }
 0x519   :  { %v1119_v8 = vmul.f32 %v1118_v50, %v1113_v21  ;;  %v1280_v21 = vld [vmem:[#allocation8 + $0x30] sm:$0xff]  ;;  %1302 = vmatpush.msrb.mxu3 %v1281_v12 }
 0x51b   :  { %v2474_v46 = vadd.f32 %v1460_v2, %v1119_v8  ;;  %v251_v2 = vadd.f32 %v2607_v34, %v2111_v55  ;;  %1303 = vmatpush.msrb.mxu3 %v1280_v21  ;;  %v1277_v55 = vld [vmem:[#allocation8 + $0x18] sm:$0xff] }
 0x51d   :  { %1143 = vmatmul.f32.vlgmr.msra.gmra.mxu3 %v2474_v46  ;;  %1163 = vmatmul.f32.vlgmr.msra.gmra.mxu0 %v2474_v46 }
 0x51e   :  { %1183 = vmatmul.f32.vlgmr.msra.gmra.mxu1 %v2474_v46  ;;  %1304 = vmatpush.msrb.mxu3 %v1279_v61 }
 0x59a   :  { %v1164_v11 = vpop.f32.mrf.mxu0 }
 0x59b   :  { %v1165_v59 = vadd.f32 %v1164_v11, %v2590_v20  ;;  %v1238_v20 = vld [vmem:[#allocation6 + $0x28] sm:$0xff]  ;;  %v1184_v57 = vpop.f32.mrf.mxu1 }
 0x59c   :  { %1263 = vmatpush.msra.mxu2 %v1238_v20  ;;  %v1185_v5 = vadd.f32 %v1184_v57, %v2108_v31  ;;  %v1278_v31 = vld [vmem:[#allocation8 + $0x20] sm:$0xff] }
 0x59d   :  { %v1207_v6 = vadd.f32 %v1165_v59, %v210_v1  ;;  %1305 = vmatpush.msrb.mxu3 %v1278_v31 }
 0x59e   :  { %1264 = vmatpush.msra.mxu2 %v1237_v30 }
 0x59f   :  { %v1379_v17 = vmul.f32 -1.442695, %v1207_v6  ;;  %1306 = vmatpush.msrb.mxu3 %v1277_v55 }
 0x5a0   :  { %v1144_v19 = vpop.f32.mrf.mxu3  ;;  %1265 = vmatpush.msra.mxu2 %v1236_v32 }
 0x5a1   :  { %v1145_v22 = vadd.f32 %v1144_v19, %v2589_v18  ;;  %1461 = vpow2.f32 %v1379_v17  ;;  %1307 = vmatpush.msrb.mxu3 %v1276_v0  ;;  %v1274_v17 = vld [vmem:[#allocation8] sm:$0xff] }
 0x5a2   :  { %1266 = vmatpush.msra.mxu2 %v1235_v37  ;;  %v1389_v19 = vld [vmem:[%s2511_s7] ss:$0 sm:$0xff] }
 0x5a3   :  { %v1187_v27 = vadd.f32 %v1145_v22, %v2606_v26  ;;  %1308 = vmatpush.msrb.mxu3 %v1275_v29 }
 0x5a4   :  { %1267 = vmatpush.msra.mxu2 %v1234_v62 }
 0x5a5   :  { %v1378_v15 = vmul.f32 -1.442695, %v1187_v27  ;;  %1309 = vmatpush.msrb.mxu3 %v1274_v17 }
 0x5a6   :  { %1268 = vmatpush.msra.mxu2 %v1233_v9 }
 0x5a7   :  { %1463 = vpow2.f32 %v1378_v15  ;;  %v1462_v36 = vpop.eup %1461 }
 0x5a8   :  { %v2484_v18 = vadd.f32 1.0, %v1462_v36 }
 0x5aa   :  { %v1223_v60 = vand.u32 2147483648, %v2484_v18  ;;  %vm1217_vm14 = vweird.f32 %v2484_v18  ;;  %v1221_v42 = vand.u32 2147483647, %v2484_v18 }
 0x5ac   :  { %v1224_v1 = vor.u32 1.1754944e-38, %v1223_v60  ;;  %vm1222_vm0 = vcmp.eq.f32.partialorder %v1221_v42, 8.507059e+37 }
 0x5ad   :  { %v1464_v39 = vpop.eup %1463 }
 0x5ae   :  { %v1191_v38 = vadd.f32 1.0, %v1464_v39 }
 0x5b0   :  { %1465 = vrcp.f32 %v1191_v38  ;;  %v1203_v52 = vand.u32 2147483648, %v1191_v38  ;;  %v1201_v56 = vand.u32 2147483647, %v1191_v38  ;;  %vm1197_vm10 = vweird.f32 %v1191_v38 }
 0x5b1   :  { %1467 = vrcp.f32 %v2484_v18 }
 0x5b2   :  { %v1204_v43 = vor.u32 1.1754944e-38, %v1203_v52  ;;  %vm1202_vm12 = vcmp.eq.f32.partialorder %v1201_v56, 8.507059e+37 }
 0x5b6   :  { %v1466_v25 = vpop.eup %1465 }
 0x5b7   :  { %v1468_v45 = vpop.eup %1467  ;;  %v1193_v47 = vmul.f32 %v1466_v25, %v1191_v38  ;;  %vm1198_vm9 = vweird.f32 %v1466_v25 }
 0x5b8   :  { %v1213_v51 = vmul.f32 %v1468_v45, %v2484_v18  ;;  %vm1199_vm11 = vmor %vm1197_vm10, %vm1198_vm9  ;;  %vm1218_vm13 = vweird.f32 %v1468_v45 }
 0x5b9   :  { %v1194_v49 = vsub.f32 1.0, %v1193_v47  ;;  %vm1219_vm15 = vmor %vm1217_vm14, %vm1218_vm13 }
 0x5ba   :  { %v1214_v10 = vsub.f32 1.0, %v1213_v51 }
 0x5bb   :  { %v1195_v54 = vmul.f32 %v1466_v25, %v1194_v49 }
 0x5bc   :  { %v1215_v50 = vmul.f32 %v1468_v45, %v1214_v10 }
 0x5bd   :  { %v1196_v7 = vadd.f32 %v1466_v25, %v1195_v54 }
 0x5be   :  { %v1216_v35 = vadd.f32 %v1468_v45, %v1215_v50 }
 0x5bf   :  { %v1200_v63 = vsel %vm1199_vm11, %v1466_v25, %v1196_v7 }
 0x5c0   :  { %v1205_v41 = vsel %vm1202_vm12, %v1204_v43, %v1200_v63  ;;  %v1220_v11 = vsel %vm1219_vm15, %v1468_v45, %v1216_v35 }
 0x5c1   :  { %v1227_v33 = vmul.f32 %v1205_v41, %v1185_v5  ;;  %v1225_v3 = vsel %vm1222_vm0, %v1224_v1, %v1220_v11 }
 0x5c3   :  { %v1228_v8 = vadd.f32 %v1227_v33, %v251_v2 }
 0x5c5   :  { %1469 = vtanh.f32 %v1228_v8 }
 0x5cb   :  { %v1470_v44 = vpop.eup %1469 }
 0x5cc   :  { %v1230_v59 = vsub.f32 %v2474_v46, %v1470_v44  ;;  %v1390_v46 = vld [vmem:[%s2513_s9] ss:$0 sm:$0xff] }
 0x5ce   :  { %v1231_v6 = vmul.f32 %v1230_v59, %v1225_v3 }
 0x5d0   :  { %v1232_v14 = vadd.f32 %v1470_v44, %v1231_v6 }
 0x5d2   :  { %1269 = vmatmul.f32.vlgmr.msra.gmra.mxu2 %v1232_v14 }
 0x655   :  { %v1270_v22 = vpop.f32.mrf.mxu2 }
 0x656   :  { %v1271_v24 = vadd.f32 %v1389_v19, %v1270_v22 }
 0x658   :  { %v1273_v26 = vmax.f32 %v1271_v24, 0.0 }
 0x65a   :  { %1310 = vmatmul.f32.vlgmr.msrb.gmra.mxu3 %v1273_v26 }
 0x6dd   :  { %v1311_v27 = vpop.f32.mrf.mxu3 }
 0x6de   :  { %v1312_v28 = vadd.f32 %v1390_v46, %v1311_v27 }
 0x6e0   :  { %1314 = vst [vmem:[#allocation9] sm:$0xff] %v1312_v28 }
 0x6e1   :  { %1325 = dma.vmem_to_hbm [thread:$0]  %s1321_s20, 128, %s1323_s23, [#allocation5]  }
 0x6e2   :  { %1619 = dma.done.wait [#allocation5], 128  }
 0x6e3   :  { %1620 = vsyncadd [#allocation5], 4294967168 }
 0x6e4   :  { %1330 = vsyncpa [#allocation4], 1 }
 0x6e5   :  { %1331 = vsyncpa [#allocation7], 1 }
 0x6e6   :  { %1332 = vsyncpa [#allocation5], 1 }

</bundles_post_ra>
